<compile_context>
chip_gen: v7x
topology: tpu7x:2x2x1
jax: 0.10.0
libtpu: 0.0.40
codegen_flags: <defaults>
</compile_context>

<pallas_src>
import functools

import jax
import jax.numpy as jnp
from jax.experimental import pallas as pl
from jax.experimental.pallas import tpu as pltpu


def _res_pointgen_kernel(x_ref, w1_ref, b1_ref, w2_ref, b2_ref,
                         w3_ref, b3_ref, w4_ref, b4_ref, init_ref, out_ref):
    # x_ref: (C, tn) f32 tile, points on lanes. Cast to bf16 in-kernel (the
    # pack is VPU work hidden under the MXU; avoids a separate XLA cast pass).
    x = x_ref[...].astype(jnp.bfloat16)

    # conv1 + bn1 + relu   (bf16 epilogue: bias-add + ReLU on half-width data)
    h = jnp.dot(w1_ref[...], x, preferred_element_type=jnp.float32)
    h = jnp.maximum(h.astype(jnp.bfloat16) + b1_ref[...], 0.0)

    # conv2 + bn2 + relu
    h = jnp.dot(w2_ref[...], h, preferred_element_type=jnp.float32)
    h = jnp.maximum(h.astype(jnp.bfloat16) + b2_ref[...], 0.0)

    # conv3 + bn3 + relu
    h = jnp.dot(w3_ref[...], h, preferred_element_type=jnp.float32)
    h = jnp.maximum(h.astype(jnp.bfloat16) + b3_ref[...], 0.0)

    # conv4 + tanh (f32, EUP) + residual; (3, tn) store is lane-dense.
    y = jnp.dot(w4_ref[...], h, preferred_element_type=jnp.float32)
    y = jnp.tanh(y + b4_ref[...])
    out_ref[...] = y + init_ref[...]


def _fold_bn(w, b, gamma, beta, mean, var, eps=1e-5):
    """Fold eval-mode BatchNorm1d into the preceding 1x1 conv.

    w: (Cout, Cin), b: (Cout,) -> effective (Cout, Cin) weight, (Cout,) bias.
    """
    s = gamma / jnp.sqrt(var + eps)            # (Cout,)
    w_eff = w * s[:, None]
    b_eff = (b - mean) * s + beta
    return w_eff, b_eff


@functools.partial(jax.jit, static_argnames=("tn",))
def res_pointgen_con(x, initial_points, params, tn=512):
    """x: (B, C, N) float32, initial_points: (B, 3, N) float32 -> (B, 3, N)."""
    B, C, N = x.shape
    assert C % 4 == 0, "bottleneck_size must be divisible by 4"
    c2, c3 = C // 2, C // 4

    # Fold eval-mode BN into conv1..conv3; conv4 keeps its own bias.
    w1, b1 = _fold_bn(params["w1"], params["b1"], params["g1"], params["be1"],
                      params["m1"], params["v1"])
    w2, b2 = _fold_bn(params["w2"], params["b2"], params["g2"], params["be2"],
                      params["m2"], params["v2"])
    w3, b3 = _fold_bn(params["w3"], params["b3"], params["g3"], params["be3"],
                      params["m3"], params["v3"])
    w4, b4 = params["w4"], params["b4"]

    # bf16 matmul weights (cast once); hidden biases bf16 (used in bf16
    # epilogue), final bias stays f32 for the tanh path.
    w1, w2, w3, w4 = (w.astype(jnp.bfloat16) for w in (w1, w2, w3, w4))
    b1, b2, b3 = (b.reshape(-1, 1).astype(jnp.bfloat16) for b in (b1, b2, b3))
    b4 = b4.reshape(-1, 1).astype(jnp.float32)

    # No padding: Pallas masks OOB stores on the partial last point tile.
    n_tiles = pl.cdiv(N, tn)

    full = lambda b, j: (0, 0)                 # grid-invariant weight / bias blocks
    tile = lambda b, j: (b, 0, j)              # (batch, full-channel, point-tile)
    # Grid-invariant blocks are fetched once -> single-buffer them (saves VMEM).
    const = lambda shape: pl.BlockSpec(shape, full, pipeline_mode=pl.Buffered(1))

    # Advisory cost estimate for XLA's scheduler.
    w_elems = C * C + c2 * C + c3 * c2 + 3 * c3
    cost = pl.CostEstimate(
        flops=2 * B * N * w_elems,
        transcendentals=3 * B * N,                         # tanh
        bytes_accessed=4 * B * C * N + 2 * w_elems + 2 * 4 * B * 3 * N,
    )

    # Explicit VMEM budget: f32 x tile x2 buffers, single-buffered bf16
    # weights, init/out tiles x2, plus an upper bound on f32 intermediates.
    vmem_est = (2 * w_elems                     # bf16 weights, 1 buffer
                + 2 * (C + c2 + c3) + 4 * 3     # biases
                + 2 * 4 * C * tn                # f32 x tile, 2 buffers
                + 4 * 4 * 3 * tn                # init + out tiles, 2 buffers each
                + 4 * (C + c2 + c3 + 3) * tn)   # f32 intermediates (upper bound)
    vmem_limit = int(min(64 << 20, 2 * vmem_est + (16 << 20)))

    out = pl.pallas_call(
        _res_pointgen_kernel,
        out_shape=jax.ShapeDtypeStruct((B, 3, N), jnp.float32),
        grid=(B, n_tiles),
        in_specs=[
            pl.BlockSpec((None, C, tn), tile),   # x tile (f32) -> (C, tn)
            const((C, C)),                       # w1_eff (Cout, Cin) bf16
            const((C, 1)),                       # b1_eff bf16
            const((c2, C)),                      # w2_eff
            const((c2, 1)),                      # b2_eff
            const((c3, c2)),                     # w3_eff
            const((c3, 1)),                      # b3_eff
            const((3, c3)),                      # w4
            const((3, 1)),                       # b4 (f32)
            pl.BlockSpec((None, 3, tn), tile),   # initial_points tile -> (3, tn)
        ],
        out_specs=pl.BlockSpec((None, 3, tn), tile),
        compiler_params=pltpu.CompilerParams(
            dimension_semantics=("parallel", "parallel"),
            vmem_limit_bytes=vmem_limit),
        cost_estimate=cost,
    )(x, w1, b1, w2, b2, w3, b3, w4, b4, initial_points)

    return out


def init_params(key, bottleneck_size):
    """Deterministic synthetic parameters matching the PyTorch module shapes.

    Conv1d weights (Cout, Cin, 1) are stored squeezed as (Cout, Cin).
    """
    C = bottleneck_size
    c2, c3 = C // 2, C // 4
    ks = jax.random.split(key, 20)
    p = {}
    # conv1: C -> C ; conv2: C -> C/2 ; conv3: C/2 -> C/4 ; conv4: C/4 -> 3
    p["w1"] = 0.05 * jax.random.normal(ks[0], (C, C), jnp.float32)
    p["b1"] = 0.05 * jax.random.normal(ks[1], (C,), jnp.float32)
    p["w2"] = 0.05 * jax.random.normal(ks[2], (c2, C), jnp.float32)
    p["b2"] = 0.05 * jax.random.normal(ks[3], (c2,), jnp.float32)
    p["w3"] = 0.05 * jax.random.normal(ks[4], (c3, c2), jnp.float32)
    p["b3"] = 0.05 * jax.random.normal(ks[5], (c3,), jnp.float32)
    p["w4"] = 0.05 * jax.random.normal(ks[6], (3, c3), jnp.float32)
    p["b4"] = 0.05 * jax.random.normal(ks[7], (3,), jnp.float32)
    # BatchNorm params (eval-mode running stats), independent keys.
    p["g1"] = 1.0 + 0.1 * jax.random.normal(ks[8], (C,), jnp.float32)
    p["be1"] = 0.1 * jax.random.normal(ks[9], (C,), jnp.float32)
    p["m1"] = 0.1 * jax.random.normal(ks[10], (C,), jnp.float32)
    p["v1"] = 1.0 + 0.1 * jax.random.uniform(ks[11], (C,), jnp.float32)
    p["g2"] = 1.0 + 0.1 * jax.random.normal(ks[12], (c2,), jnp.float32)
    p["be2"] = 0.1 * jax.random.normal(ks[13], (c2,), jnp.float32)
    p["m2"] = 0.1 * jax.random.normal(ks[14], (c2,), jnp.float32)
    p["v2"] = 1.0 + 0.1 * jax.random.uniform(ks[15], (c2,), jnp.float32)
    p["g3"] = 1.0 + 0.1 * jax.random.normal(ks[16], (c3,), jnp.float32)
    p["be3"] = 0.1 * jax.random.normal(ks[17], (c3,), jnp.float32)
    p["m3"] = 0.1 * jax.random.normal(ks[18], (c3,), jnp.float32)
    p["v3"] = 1.0 + 0.1 * jax.random.uniform(ks[19], (c3,), jnp.float32)
    return p


def reference_forward(x, initial_points, params, eps=1e-5):
    """Pure-JAX f32 reference (eval-mode BN), NCW in / NCW out."""
    def conv(h, w, b):   # h: (B, Cin, N), w: (Cout, Cin)
        return jnp.einsum("oc,bcn->bon", w, h) + b[None, :, None]

    def bn(h, g, be, m, v):
        s = g / jnp.sqrt(v + eps)
        return h * s[None, :, None] + (be - m * s)[None, :, None]

    h = jax.nn.relu(bn(conv(x, params["w1"], params["b1"]),
                       params["g1"], params["be1"], params["m1"], params["v1"]))
    h = jax.nn.relu(bn(conv(h, params["w2"], params["b2"]),
                       params["g2"], params["be2"], params["m2"], params["v2"]))
    h = jax.nn.relu(bn(conv(h, params["w3"], params["b3"]),
                       params["g3"], params["be3"], params["m3"], params["v3"]))
    h = jnp.tanh(conv(h, params["w4"], params["b4"]))
    return h + initial_points


if __name__ == "__main__":
    bottleneck_size = 256   # small synthetic size (divisible by 4)
    B, N = 2, 500           # batch, number of points (not a multiple of tn ->
                            # exercises the masked partial last tile, no pad)

    key = jax.random.PRNGKey(0)
    k_x, k_i, k_p = jax.random.split(key, 3)

    x = jax.random.normal(k_x, (B, bottleneck_size, N), jnp.float32)
    initial_points = jax.random.normal(k_i, (B, 3, N), jnp.float32)
    params = init_params(k_p, bottleneck_size)

    # tn=256: multiple of 256 (MXU) and gives B * n_tiles = 4 grid steps, so a
    # v7x megacore gets >=2 pipelined steps per TensorCore even at this tiny N.
    out = res_pointgen_con(x, initial_points, params, tn=256)
    out = jax.block_until_ready(out)

    ref = reference_forward(x, initial_points, params)
    assert out.shape == (B, 3, N)
    # bf16 matmul operands / epilogues with f32 accumulation -> relaxed tol.
    assert jnp.allclose(out, ref, atol=3e-2, rtol=3e-2), "mismatch vs reference"

    print("KERNEL_OK")
</pallas_src>

<mosaic_0001>
module attributes {stable_mosaic.version = 11 : i64} {
  func.func @_res_pointgen_kernel(%arg0: i32, %arg1: i32, %arg2: memref<1x256x256xf32, #tpu.memory_space<vmem>>, %arg3: memref<256x256xbf16, #tpu.memory_space<vmem>>, %arg4: memref<256x1xbf16, #tpu.memory_space<vmem>>, %arg5: memref<128x256xbf16, #tpu.memory_space<vmem>>, %arg6: memref<128x1xbf16, #tpu.memory_space<vmem>>, %arg7: memref<64x128xbf16, #tpu.memory_space<vmem>>, %arg8: memref<64x1xbf16, #tpu.memory_space<vmem>>, %arg9: memref<3x64xbf16, #tpu.memory_space<vmem>>, %arg10: memref<3x1xf32, #tpu.memory_space<vmem>>, %arg11: memref<1x3x256xf32, #tpu.memory_space<vmem>>, %arg12: memref<1x3x256xf32, #tpu.memory_space<vmem>>) attributes {dimension_semantics = [#tpu.dimension_semantics<parallel>, #tpu.dimension_semantics<parallel>], iteration_bounds = array<i64: 2, 2>, scalar_prefetch = 0 : i64, scratch_operands = 0 : i64, tpu.core_type = #tpu.core_type<tc>, window_params = [{transform_indices = @transform_0, window_bounds = array<i64: 1, 256, 256>}, {pipeline_mode = #tpu.pipeline_mode<synchronous>, transform_indices = @transform_1, window_bounds = array<i64: 256, 256>}, {pipeline_mode = #tpu.pipeline_mode<synchronous>, transform_indices = @transform_2, window_bounds = array<i64: 256, 1>}, {pipeline_mode = #tpu.pipeline_mode<synchronous>, transform_indices = @transform_3, window_bounds = array<i64: 128, 256>}, {pipeline_mode = #tpu.pipeline_mode<synchronous>, transform_indices = @transform_4, window_bounds = array<i64: 128, 1>}, {pipeline_mode = #tpu.pipeline_mode<synchronous>, transform_indices = @transform_5, window_bounds = array<i64: 64, 128>}, {pipeline_mode = #tpu.pipeline_mode<synchronous>, transform_indices = @transform_6, window_bounds = array<i64: 64, 1>}, {pipeline_mode = #tpu.pipeline_mode<synchronous>, transform_indices = @transform_7, window_bounds = array<i64: 3, 64>}, {pipeline_mode = #tpu.pipeline_mode<synchronous>, transform_indices = @transform_8, window_bounds = array<i64: 3, 1>}, {transform_indices = @transform_9, window_bounds = array<i64: 1, 3, 256>}, {transform_indices = @transform_10, window_bounds = array<i64: 1, 3, 256>}]} {
    %c0 = arith.constant 0 : index
    %c0_0 = arith.constant 0 : index
    %c0_1 = arith.constant 0 : index
    %0 = vector.load %arg2[%c0, %c0_0, %c0_1] : memref<1x256x256xf32, #tpu.memory_space<vmem>>, vector<1x256x256xf32>
    %1 = vector.shape_cast %0 : vector<1x256x256xf32> to vector<256x256xf32>
    %2 = arith.truncf %1 : vector<256x256xf32> to vector<256x256xbf16>
    %c0_2 = arith.constant 0 : index
    %c0_3 = arith.constant 0 : index
    %3 = vector.load %arg3[%c0_2, %c0_3] : memref<256x256xbf16, #tpu.memory_space<vmem>>, vector<256x256xbf16>
    %cst = arith.constant dense<0.000000e+00> : vector<256x256xf32>
    %4 = tpu.matmul %3, %2, %cst {dimension_numbers = #tpu.dot_dimension_numbers<[1], [0], [0], [1], [0, 0, 1, 1], [], []>} : vector<256x256xbf16>, vector<256x256xbf16>, vector<256x256xf32> -> vector<256x256xf32>
    %5 = arith.truncf %4 : vector<256x256xf32> to vector<256x256xbf16>
    %c0_4 = arith.constant 0 : index
    %c0_5 = arith.constant 0 : index
    %6 = vector.load %arg4[%c0_4, %c0_5] : memref<256x1xbf16, #tpu.memory_space<vmem>>, vector<256x1xbf16>
    %7 = vector.broadcast %6 : vector<256x1xbf16> to vector<256x256xbf16>
    %8 = arith.addf %5, %7 : vector<256x256xbf16>
    %cst_6 = arith.constant 0.000000e+00 : bf16
    %9 = vector.broadcast %cst_6 : bf16 to vector<256x256xbf16>
    %10 = arith.maximumf %8, %9 : vector<256x256xbf16>
    %c0_7 = arith.constant 0 : index
    %c0_8 = arith.constant 0 : index
    %11 = vector.load %arg5[%c0_7, %c0_8] : memref<128x256xbf16, #tpu.memory_space<vmem>>, vector<128x256xbf16>
    %cst_9 = arith.constant dense<0.000000e+00> : vector<128x256xf32>
    %12 = tpu.matmul %11, %10, %cst_9 {dimension_numbers = #tpu.dot_dimension_numbers<[1], [0], [0], [1], [0, 0, 1, 1], [], []>} : vector<128x256xbf16>, vector<256x256xbf16>, vector<128x256xf32> -> vector<128x256xf32>
    %13 = arith.truncf %12 : vector<128x256xf32> to vector<128x256xbf16>
    %c0_10 = arith.constant 0 : index
    %c0_11 = arith.constant 0 : index
    %14 = vector.load %arg6[%c0_10, %c0_11] : memref<128x1xbf16, #tpu.memory_space<vmem>>, vector<128x1xbf16>
    %15 = vector.broadcast %14 : vector<128x1xbf16> to vector<128x256xbf16>
    %16 = arith.addf %13, %15 : vector<128x256xbf16>
    %cst_12 = arith.constant 0.000000e+00 : bf16
    %17 = vector.broadcast %cst_12 : bf16 to vector<128x256xbf16>
    %18 = arith.maximumf %16, %17 : vector<128x256xbf16>
    %c0_13 = arith.constant 0 : index
    %c0_14 = arith.constant 0 : index
    %19 = vector.load %arg7[%c0_13, %c0_14] : memref<64x128xbf16, #tpu.memory_space<vmem>>, vector<64x128xbf16>
    %cst_15 = arith.constant dense<0.000000e+00> : vector<64x256xf32>
    %20 = tpu.matmul %19, %18, %cst_15 {dimension_numbers = #tpu.dot_dimension_numbers<[1], [0], [0], [1], [0, 0, 1, 1], [], []>} : vector<64x128xbf16>, vector<128x256xbf16>, vector<64x256xf32> -> vector<64x256xf32>
    %21 = arith.truncf %20 : vector<64x256xf32> to vector<64x256xbf16>
    %c0_16 = arith.constant 0 : index
    %c0_17 = arith.constant 0 : index
    %22 = vector.load %arg8[%c0_16, %c0_17] : memref<64x1xbf16, #tpu.memory_space<vmem>>, vector<64x1xbf16>
    %23 = vector.broadcast %22 : vector<64x1xbf16> to vector<64x256xbf16>
    %24 = arith.addf %21, %23 : vector<64x256xbf16>
    %cst_18 = arith.constant 0.000000e+00 : bf16
    %25 = vector.broadcast %cst_18 : bf16 to vector<64x256xbf16>
    %26 = arith.maximumf %24, %25 : vector<64x256xbf16>
    %c0_19 = arith.constant 0 : index
    %c0_20 = arith.constant 0 : index
    %27 = vector.load %arg9[%c0_19, %c0_20] : memref<3x64xbf16, #tpu.memory_space<vmem>>, vector<3x64xbf16>
    %cst_21 = arith.constant dense<0.000000e+00> : vector<3x256xf32>
    %28 = tpu.matmul %27, %26, %cst_21 {dimension_numbers = #tpu.dot_dimension_numbers<[1], [0], [0], [1], [0, 0, 1, 1], [], []>} : vector<3x64xbf16>, vector<64x256xbf16>, vector<3x256xf32> -> vector<3x256xf32>
    %c0_22 = arith.constant 0 : index
    %c0_23 = arith.constant 0 : index
    %29 = vector.load %arg10[%c0_22, %c0_23] : memref<3x1xf32, #tpu.memory_space<vmem>>, vector<3x1xf32>
    %30 = vector.broadcast %29 : vector<3x1xf32> to vector<3x256xf32>
    %31 = arith.addf %28, %30 : vector<3x256xf32>
    %32 = math.tanh %31 : vector<3x256xf32>
    %c0_24 = arith.constant 0 : index
    %c0_25 = arith.constant 0 : index
    %c0_26 = arith.constant 0 : index
    %33 = vector.load %arg11[%c0_24, %c0_25, %c0_26] : memref<1x3x256xf32, #tpu.memory_space<vmem>>, vector<1x3x256xf32>
    %34 = vector.shape_cast %33 : vector<1x3x256xf32> to vector<3x256xf32>
    %35 = arith.addf %32, %34 : vector<3x256xf32>
    %c0_27 = arith.constant 0 : index
    %c0_28 = arith.constant 0 : index
    %c0_29 = arith.constant 0 : index
    %36 = vector.load %arg12[%c0_27, %c0_28, %c0_29] : memref<1x3x256xf32, #tpu.memory_space<vmem>>, vector<1x3x256xf32>
    %37 = vector.shape_cast %36 : vector<1x3x256xf32> to vector<3x256xf32>
    %38 = vector.shape_cast %35 : vector<3x256xf32> to vector<1x3x256xf32>
    tpu.vector_store %arg12[%c0_27, %c0_28, %c0_29], %38 {strides = array<i32>} : memref<1x3x256xf32, #tpu.memory_space<vmem>>, vector<1x3x256xf32>,
    return
  }
  func.func @transform_0(%arg0: i32, %arg1: i32) -> (i32, i32, i32) {
    %c0_i32 = arith.constant 0 : i32
    %c0_i32_0 = arith.constant 0 : i32
    return %arg0, %c0_i32, %arg1 : i32, i32, i32
  }
  func.func @transform_1(%arg0: i32, %arg1: i32) -> (i32, i32) {
    %c0_i32 = arith.constant 0 : i32
    %c0_i32_0 = arith.constant 0 : i32
    %c0_i32_1 = arith.constant 0 : i32
    return %c0_i32, %c0_i32_0 : i32, i32
  }
  func.func @transform_2(%arg0: i32, %arg1: i32) -> (i32, i32) {
    %c0_i32 = arith.constant 0 : i32
    %c0_i32_0 = arith.constant 0 : i32
    %c0_i32_1 = arith.constant 0 : i32
    return %c0_i32, %c0_i32_0 : i32, i32
  }
  func.func @transform_3(%arg0: i32, %arg1: i32) -> (i32, i32) {
    %c0_i32 = arith.constant 0 : i32
    %c0_i32_0 = arith.constant 0 : i32
    %c0_i32_1 = arith.constant 0 : i32
    return %c0_i32, %c0_i32_0 : i32, i32
  }
  func.func @transform_4(%arg0: i32, %arg1: i32) -> (i32, i32) {
    %c0_i32 = arith.constant 0 : i32
    %c0_i32_0 = arith.constant 0 : i32
    %c0_i32_1 = arith.constant 0 : i32
    return %c0_i32, %c0_i32_0 : i32, i32
  }
  func.func @transform_5(%arg0: i32, %arg1: i32) -> (i32, i32) {
    %c0_i32 = arith.constant 0 : i32
    %c0_i32_0 = arith.constant 0 : i32
    %c0_i32_1 = arith.constant 0 : i32
    return %c0_i32, %c0_i32_0 : i32, i32
  }
  func.func @transform_6(%arg0: i32, %arg1: i32) -> (i32, i32) {
    %c0_i32 = arith.constant 0 : i32
    %c0_i32_0 = arith.constant 0 : i32
    %c0_i32_1 = arith.constant 0 : i32
    return %c0_i32, %c0_i32_0 : i32, i32
  }
  func.func @transform_7(%arg0: i32, %arg1: i32) -> (i32, i32) {
    %c0_i32 = arith.constant 0 : i32
    %c0_i32_0 = arith.constant 0 : i32
    %c0_i32_1 = arith.constant 0 : i32
    return %c0_i32, %c0_i32_0 : i32, i32
  }
  func.func @transform_8(%arg0: i32, %arg1: i32) -> (i32, i32) {
    %c0_i32 = arith.constant 0 : i32
    %c0_i32_0 = arith.constant 0 : i32
    %c0_i32_1 = arith.constant 0 : i32
    return %c0_i32, %c0_i32_0 : i32, i32
  }
  func.func @transform_9(%arg0: i32, %arg1: i32) -> (i32, i32, i32) {
    %c0_i32 = arith.constant 0 : i32
    %c0_i32_0 = arith.constant 0 : i32
    return %arg0, %c0_i32, %arg1 : i32, i32, i32
  }
  func.func @transform_10(%arg0: i32, %arg1: i32) -> (i32, i32, i32) {
    %c0_i32 = arith.constant 0 : i32
    %c0_i32_0 = arith.constant 0 : i32
    return %arg0, %c0_i32, %arg1 : i32, i32, i32
  }
}

</mosaic_0001>

<bundles_post_ra>
// kernel: res_pointgen_con.1
= control target key start
LH: loop header
LB: loop body
LE: loop exit
PB: predicated region body
PF: predicated region fallthrough
CT: control target
= control target key end

     0   :  { %s2959_s13 = smov 0   ;;  %s2961_s14 = smov 0   ;;  %s3701_s0 = inlined_call_operand.vmem [shape: f32[2,256,500], index: 0, kind: input, shape index: {}]   ;;  %s3702_s1 = inlined_call_operand.vmem [shape: bf16[256,256], index: 1, kind: input, shape index: {}]   ;;  %s3703_s2 = inlined_call_operand.vmem [shape: bf16[256,1], index: 2, kind: input, shape index: {}]   ;;  %s3704_s3 = inlined_call_operand.vmem [shape: bf16[128,256], index: 3, kind: input, shape index: {}]   ;;  %s3705_s4 = inlined_call_operand.vmem [shape: bf16[128,1], index: 4, kind: input, shape index: {}]   ;;  %s3706_s5 = inlined_call_operand.vmem [shape: bf16[64,128], index: 5, kind: input, shape index: {}]   ;;  %s3707_s6 = inlined_call_operand.vmem [shape: bf16[64,1], index: 6, kind: input, shape index: {}]   ;;  %s3708_s7 = inlined_call_operand.vmem [shape: bf16[3,64], index: 7, kind: input, shape index: {}]   ;;  %s3709_s8 = inlined_call_operand.vmem [shape: f32[3,1], index: 8, kind: input, shape index: {}]   ;;  %s3710_s9 = inlined_call_operand.vmem [shape: f32[2,3,500], index: 9, kind: input, shape index: {}]   ;;  %s3711_s10 = inlined_call_operand.vmem [shape: f32[2,3,500], index: 10, kind: output, shape index: {}]  }
   0x1   :  { %s2963_s15 = smov 0   ;;  %s2965_s16 = smov 0  }
   0x2   :  { %s2967_s17 = smov 0   ;;  %s2969_s18 = smov 0  }
   0x3   :  { %s2971_s19 = smov 0  }
   0x4 LB: > { %s29_s20 = sadd.s32 1, %s2892_s17  ;;  %s32_s21 = sadd.s32 1, %s2896_s18  ;;  %s2900_s19 = sphi %s2971_s19, %s20_s19   ;;  %s2896_s18 = sphi %s2969_s18, %s3723_s18   ;;  %s2892_s17 = sphi %s2967_s17, %s3722_s17   ;;  %s2888_s16 = sphi %s2965_s16, %s3721_s16   ;;  %s2884_s15 = sphi %s2963_s15, %s3720_s15   ;;  %s2880_s14 = sphi %s2961_s14, %s3719_s14   ;;  %s2876_s13 = sphi %s2959_s13, %s3718_s13  }
   0x5   : > { %p30_p0 = scmp.ge.s32.totalorder %s29_s20, 2  ;;  %p48_p1 = scmp.ne.s32.totalorder %s2880_s14, %s2876_s13 }
   0x6   : > { %p49_p2 = scmp.eq.s32.totalorder %s2900_s19, 0  ;;  %s41_s25 = sadd.s32 1, %s2880_s14 }
   0x7   : > { %s3725_s20 = smov (%p30_p0, %s29_s20), 0  ;;  %s3727_s21 = smov (!%p30_p0, %s32_s21), %s2896_s18 }
   0x8   : > { %3714 = sst [smem:[#allocation3_spill]] %s3725_s20  ;;  %p50_p3 = por %p49_p2, %p48_p1 }
   0x9   : > { %p34_p4 = scmp.ge.s32.totalorder %s3727_s21, 2  ;;  %s37_s22 = ssub.s32 %s2892_s17, %s3725_s20 }
   0xa   : > { %p2609_p6 = scmp.ge.s32.totalorder %s2900_s19, 4 }
   0xb   : > { %s3729_s21 = smov (%p34_p4, %s3727_s21), 0 }
   0xc   : > { %3715 = sst [smem:[#allocation4_spill]] %s3729_s21  ;;  %s36_s23 = ssub.s32 %s2896_s18, %s3729_s21 }
   0xd   : > { %s38_s24 = sor.u32 %s37_s22, %s36_s23  ;;  %322 = sbr.rel (%p2609_p6) target bundleno = 59 (0x3b), region = 48 }
   0xe   : > { %p39_p5 = scmp.eq.s32.totalorder %s38_s24, 0 }
  0x10   : > { %s3010_s26 = scalar_select %p39_p5, %s2880_s14, %s41_s25  }
  0x14   : > { %325 = sbr.rel (!%p50_p3) target bundleno = 59 (0x3b), region = 52  ;;  %s327_s27 = sand.u32 (%p50_p3), 1, %s2880_s14  }
  0x15   : > { %s2611_s28 = sshll.u32 (%p50_p3), %s2892_s17, 1  ;;  %s2610_s29 = sshll.u32 (%p50_p3), %s327_s27, 9 }
  0x16   : > { %s2612_s30 = sshll.u32 (%p50_p3), %s2896_s18, 7  ;;  %s3024_s23 = scalar_lea.vmem (%p50_p3), [#allocation2], %s2610_s29 }
  0x17   : > { %s332_s11 = sadd.s32 (%p50_p3), %s2612_s30, %s2611_s28 }
  0x18   : > { %s2613_s12 = sshll.u32 (%p50_p3), %s332_s11, 3 }
  0x19   : > { %s3019_s22 = scalar_lea.vmem (%p50_p3), %s3701_s0, %s2613_s12 }
  0x1a   : > { %v347_v0 = vld [vmem:[%s3019_s22] sm:$0xff] (%p50_p3)  ;;  %v349_v1 = vld [vmem:[%s3019_s22 + $0x8] sm:$0xff] (%p50_p3) }
  0x1b   : > { %v351_v2 = vld [vmem:[%s3019_s22 + $0x20] sm:$0xff]  ;;  %348 = vst [vmem:[%s3024_s23] sm:$0xff] %v347_v0  ;;  %350 = vst [vmem:[%s3024_s23 + $0x8] sm:$0xff] %v349_v1  ;;  %v353_v3 = vld [vmem:[%s3019_s22 + $0x28] sm:$0xff] }
  0x1c   : > { %352 = vst [vmem:[%s3024_s23 + $0x10] sm:$0xff] %v351_v2  ;;  %v355_v4 = vld [vmem:[%s3019_s22 + $0x40] sm:$0xff]  ;;  %v357_v5 = vld [vmem:[%s3019_s22 + $0x48] sm:$0xff]  ;;  %354 = vst [vmem:[%s3024_s23 + $0x18] sm:$0xff] %v353_v3 }
  0x1d   : > { %356 = vst [vmem:[%s3024_s23 + $0x20] sm:$0xff] %v355_v4  ;;  %358 = vst [vmem:[%s3024_s23 + $0x28] sm:$0xff] %v357_v5  ;;  %v359_v6 = vld [vmem:[%s3019_s22 + $0x60] sm:$0xff]  ;;  %v361_v7 = vld [vmem:[%s3019_s22 + $0x68] sm:$0xff] }
  0x1e   : > { %v363_v8 = vld [vmem:[%s3019_s22 + $0x80] sm:$0xff]  ;;  %360 = vst [vmem:[%s3024_s23 + $0x30] sm:$0xff] %v359_v6  ;;  %362 = vst [vmem:[%s3024_s23 + $0x38] sm:$0xff] %v361_v7  ;;  %v365_v9 = vld [vmem:[%s3019_s22 + $0x88] sm:$0xff] }
  0x1f   : > { %364 = vst [vmem:[%s3024_s23 + $0x40] sm:$0xff] %v363_v8  ;;  %v367_v10 = vld [vmem:[%s3019_s22 + $0xa0] sm:$0xff]  ;;  %v369_v11 = vld [vmem:[%s3019_s22 + $0xa8] sm:$0xff]  ;;  %366 = vst [vmem:[%s3024_s23 + $0x48] sm:$0xff] %v365_v9 }
  0x20   : > { %368 = vst [vmem:[%s3024_s23 + $0x50] sm:$0xff] %v367_v10  ;;  %370 = vst [vmem:[%s3024_s23 + $0x58] sm:$0xff] %v369_v11  ;;  %v371_v12 = vld [vmem:[%s3019_s22 + $0xc0] sm:$0xff]  ;;  %v373_v13 = vld [vmem:[%s3019_s22 + $0xc8] sm:$0xff] }
  0x21   : > { %v375_v14 = vld [vmem:[%s3019_s22 + $0xe0] sm:$0xff]  ;;  %372 = vst [vmem:[%s3024_s23 + $0x60] sm:$0xff] %v371_v12  ;;  %374 = vst [vmem:[%s3024_s23 + $0x68] sm:$0xff] %v373_v13  ;;  %v377_v15 = vld [vmem:[%s3019_s22 + $0xe8] sm:$0xff] }
  0x22   : > { %376 = vst [vmem:[%s3024_s23 + $0x70] sm:$0xff] %v375_v14  ;;  %v379_v16 = vld [vmem:[%s3019_s22 + $0x100] sm:$0xff]  ;;  %v381_v17 = vld [vmem:[%s3019_s22 + $0x108] sm:$0xff]  ;;  %378 = vst [vmem:[%s3024_s23 + $0x78] sm:$0xff] %v377_v15 }
  0x23   : > { %380 = vst [vmem:[%s3024_s23 + $0x80] sm:$0xff] %v379_v16  ;;  %382 = vst [vmem:[%s3024_s23 + $0x88] sm:$0xff] %v381_v17  ;;  %v383_v18 = vld [vmem:[%s3019_s22 + $0x120] sm:$0xff]  ;;  %v385_v19 = vld [vmem:[%s3019_s22 + $0x128] sm:$0xff] }
  0x24   : > { %v387_v20 = vld [vmem:[%s3019_s22 + $0x140] sm:$0xff]  ;;  %384 = vst [vmem:[%s3024_s23 + $0x90] sm:$0xff] %v383_v18  ;;  %386 = vst [vmem:[%s3024_s23 + $0x98] sm:$0xff] %v385_v19  ;;  %v389_v21 = vld [vmem:[%s3019_s22 + $0x148] sm:$0xff] }
  0x25   : > { %388 = vst [vmem:[%s3024_s23 + $0xa0] sm:$0xff] %v387_v20  ;;  %v391_v22 = vld [vmem:[%s3019_s22 + $0x160] sm:$0xff]  ;;  %v393_v23 = vld [vmem:[%s3019_s22 + $0x168] sm:$0xff]  ;;  %390 = vst [vmem:[%s3024_s23 + $0xa8] sm:$0xff] %v389_v21 }
  0x26   : > { %392 = vst [vmem:[%s3024_s23 + $0xb0] sm:$0xff] %v391_v22  ;;  %394 = vst [vmem:[%s3024_s23 + $0xb8] sm:$0xff] %v393_v23  ;;  %v395_v24 = vld [vmem:[%s3019_s22 + $0x180] sm:$0xff]  ;;  %v397_v25 = vld [vmem:[%s3019_s22 + $0x188] sm:$0xff] }
  0x27   : > { %v399_v26 = vld [vmem:[%s3019_s22 + $0x1a0] sm:$0xff]  ;;  %396 = vst [vmem:[%s3024_s23 + $0xc0] sm:$0xff] %v395_v24  ;;  %398 = vst [vmem:[%s3024_s23 + $0xc8] sm:$0xff] %v397_v25  ;;  %v401_v27 = vld [vmem:[%s3019_s22 + $0x1a8] sm:$0xff] }
  0x28   : > { %400 = vst [vmem:[%s3024_s23 + $0xd0] sm:$0xff] %v399_v26  ;;  %v403_v28 = vld [vmem:[%s3019_s22 + $0x1c0] sm:$0xff]  ;;  %v405_v29 = vld [vmem:[%s3019_s22 + $0x1c8] sm:$0xff]  ;;  %402 = vst [vmem:[%s3024_s23 + $0xd8] sm:$0xff] %v401_v27 }
  0x29   : > { %404 = vst [vmem:[%s3024_s23 + $0xe0] sm:$0xff] %v403_v28  ;;  %406 = vst [vmem:[%s3024_s23 + $0xe8] sm:$0xff] %v405_v29  ;;  %v407_v30 = vld [vmem:[%s3019_s22 + $0x1e0] sm:$0xff]  ;;  %v409_v31 = vld [vmem:[%s3019_s22 + $0x1e8] sm:$0xff] }
  0x2a   : > { %v411_v32 = vld [vmem:[%s3019_s22 + $0x200] sm:$0xff]  ;;  %408 = vst [vmem:[%s3024_s23 + $0xf0] sm:$0xff] %v407_v30  ;;  %410 = vst [vmem:[%s3024_s23 + $0xf8] sm:$0xff] %v409_v31  ;;  %v413_v33 = vld [vmem:[%s3019_s22 + $0x208] sm:$0xff] }
  0x2b   : > { %412 = vst [vmem:[%s3024_s23 + $0x100] sm:$0xff] %v411_v32  ;;  %v415_v34 = vld [vmem:[%s3019_s22 + $0x220] sm:$0xff]  ;;  %v417_v35 = vld [vmem:[%s3019_s22 + $0x228] sm:$0xff]  ;;  %414 = vst [vmem:[%s3024_s23 + $0x108] sm:$0xff] %v413_v33 }
  0x2c   : > { %416 = vst [vmem:[%s3024_s23 + $0x110] sm:$0xff] %v415_v34  ;;  %418 = vst [vmem:[%s3024_s23 + $0x118] sm:$0xff] %v417_v35  ;;  %v419_v36 = vld [vmem:[%s3019_s22 + $0x240] sm:$0xff]  ;;  %v421_v37 = vld [vmem:[%s3019_s22 + $0x248] sm:$0xff] }
  0x2d   : > { %v423_v38 = vld [vmem:[%s3019_s22 + $0x260] sm:$0xff]  ;;  %420 = vst [vmem:[%s3024_s23 + $0x120] sm:$0xff] %v419_v36  ;;  %422 = vst [vmem:[%s3024_s23 + $0x128] sm:$0xff] %v421_v37  ;;  %v425_v39 = vld [vmem:[%s3019_s22 + $0x268] sm:$0xff] }
  0x2e   : > { %424 = vst [vmem:[%s3024_s23 + $0x130] sm:$0xff] %v423_v38  ;;  %v427_v40 = vld [vmem:[%s3019_s22 + $0x280] sm:$0xff]  ;;  %v429_v41 = vld [vmem:[%s3019_s22 + $0x288] sm:$0xff]  ;;  %426 = vst [vmem:[%s3024_s23 + $0x138] sm:$0xff] %v425_v39 }
  0x2f   : > { %428 = vst [vmem:[%s3024_s23 + $0x140] sm:$0xff] %v427_v40  ;;  %430 = vst [vmem:[%s3024_s23 + $0x148] sm:$0xff] %v429_v41  ;;  %v431_v42 = vld [vmem:[%s3019_s22 + $0x2a0] sm:$0xff]  ;;  %v433_v43 = vld [vmem:[%s3019_s22 + $0x2a8] sm:$0xff] }
  0x30   : > { %v435_v44 = vld [vmem:[%s3019_s22 + $0x2c0] sm:$0xff]  ;;  %432 = vst [vmem:[%s3024_s23 + $0x150] sm:$0xff] %v431_v42  ;;  %434 = vst [vmem:[%s3024_s23 + $0x158] sm:$0xff] %v433_v43  ;;  %v437_v45 = vld [vmem:[%s3019_s22 + $0x2c8] sm:$0xff] }
  0x31   : > { %436 = vst [vmem:[%s3024_s23 + $0x160] sm:$0xff] %v435_v44  ;;  %v439_v46 = vld [vmem:[%s3019_s22 + $0x2e0] sm:$0xff]  ;;  %v441_v47 = vld [vmem:[%s3019_s22 + $0x2e8] sm:$0xff]  ;;  %438 = vst [vmem:[%s3024_s23 + $0x168] sm:$0xff] %v437_v45 }
  0x32   : > { %440 = vst [vmem:[%s3024_s23 + $0x170] sm:$0xff] %v439_v46  ;;  %442 = vst [vmem:[%s3024_s23 + $0x178] sm:$0xff] %v441_v47  ;;  %v443_v48 = vld [vmem:[%s3019_s22 + $0x300] sm:$0xff]  ;;  %v445_v49 = vld [vmem:[%s3019_s22 + $0x308] sm:$0xff] }
  0x33   : > { %v447_v50 = vld [vmem:[%s3019_s22 + $0x320] sm:$0xff]  ;;  %444 = vst [vmem:[%s3024_s23 + $0x180] sm:$0xff] %v443_v48  ;;  %446 = vst [vmem:[%s3024_s23 + $0x188] sm:$0xff] %v445_v49  ;;  %v449_v51 = vld [vmem:[%s3019_s22 + $0x328] sm:$0xff] }
  0x34   : > { %448 = vst [vmem:[%s3024_s23 + $0x190] sm:$0xff] %v447_v50  ;;  %v451_v52 = vld [vmem:[%s3019_s22 + $0x340] sm:$0xff]  ;;  %v453_v53 = vld [vmem:[%s3019_s22 + $0x348] sm:$0xff]  ;;  %450 = vst [vmem:[%s3024_s23 + $0x198] sm:$0xff] %v449_v51 }
  0x35   : > { %452 = vst [vmem:[%s3024_s23 + $0x1a0] sm:$0xff] %v451_v52  ;;  %454 = vst [vmem:[%s3024_s23 + $0x1a8] sm:$0xff] %v453_v53  ;;  %v455_v54 = vld [vmem:[%s3019_s22 + $0x360] sm:$0xff]  ;;  %v457_v55 = vld [vmem:[%s3019_s22 + $0x368] sm:$0xff] }
  0x36   : > { %v459_v56 = vld [vmem:[%s3019_s22 + $0x380] sm:$0xff]  ;;  %456 = vst [vmem:[%s3024_s23 + $0x1b0] sm:$0xff] %v455_v54  ;;  %458 = vst [vmem:[%s3024_s23 + $0x1b8] sm:$0xff] %v457_v55  ;;  %v461_v57 = vld [vmem:[%s3019_s22 + $0x388] sm:$0xff] }
  0x37   : > { %460 = vst [vmem:[%s3024_s23 + $0x1c0] sm:$0xff] %v459_v56  ;;  %v463_v58 = vld [vmem:[%s3019_s22 + $0x3a0] sm:$0xff]  ;;  %v465_v59 = vld [vmem:[%s3019_s22 + $0x3a8] sm:$0xff]  ;;  %462 = vst [vmem:[%s3024_s23 + $0x1c8] sm:$0xff] %v461_v57 }
  0x38   : > { %464 = vst [vmem:[%s3024_s23 + $0x1d0] sm:$0xff] %v463_v58  ;;  %466 = vst [vmem:[%s3024_s23 + $0x1d8] sm:$0xff] %v465_v59  ;;  %v467_v60 = vld [vmem:[%s3019_s22 + $0x3c0] sm:$0xff]  ;;  %v469_v61 = vld [vmem:[%s3019_s22 + $0x3c8] sm:$0xff] }
  0x39   : > { %v471_v62 = vld [vmem:[%s3019_s22 + $0x3e0] sm:$0xff]  ;;  %468 = vst [vmem:[%s3024_s23 + $0x1e0] sm:$0xff] %v467_v60  ;;  %470 = vst [vmem:[%s3024_s23 + $0x1e8] sm:$0xff] %v469_v61  ;;  %v473_v63 = vld [vmem:[%s3019_s22 + $0x3e8] sm:$0xff] }
  0x3a   : > { %472 = vst [vmem:[%s3024_s23 + $0x1f0] sm:$0xff] %v471_v62  ;;  %474 = vst [vmem:[%s3024_s23 + $0x1f8] sm:$0xff] %v473_v63 }
  0x3b PF: > { %p2614_p7 = scmp.ge.s32.totalorder %s2900_s19, 1  ;;  %p492_p8 = scmp.lt.s32.totalorder %s2900_s19, 5 }
  0x3d   : > { %p493_p9 = pnand %p2614_p7, %p492_p8 }
  0x3e   : > { %s499_s20 = sand.u32 (!%p493_p9), 1, %s2876_s13   ;;  %v2767_v0 = vld [vmem:[%s3702_s1 + $0x4] ss:$8 sps:$4 sm:$0xff] (!%p493_p9)   ;;  %v2902_v1 = vmov (!%p493_p9), 0   ;;  %v1084_v45 = vld [vmem:[%s3703_s2] sm:$0xf] (!%p493_p9) }
  0x3f   : > { %496 = sbr.rel (%p493_p9) target bundleno = 1238 (0x4d6), region = 79  ;;  %s2615_s21 = sshll.u32 (!%p493_p9), %s499_s20, 9  ;;  %2763 = vset.pattern.permute.xlu0 (!%p493_p9), %v2902_v1  ;;  %2764 = vset.pattern.permute.xlu1 (!%p493_p9), %v2902_v1  ;;  %v1086_v50 = vld [vmem:[%s3703_s2 + $0x8] sm:$0xf] (!%p493_p9)  ;;  %v1085_v51 = vld [vmem:[%s3703_s2 + $0x4] sm:$0xf] (!%p493_p9) }
  0x40   : > { %s3159_s27 = scalar_lea.vmem (!%p493_p9), [#allocation2], %s2615_s21  ;;  %891 = vmatprep.mubr.bf16.mxu0 (!%p493_p9), %v2767_v0  ;;  %1118 = vperm.xlu0 (!%p493_p9), %2763, %v1084_v45   ;;  %v1087_v54 = vld [vmem:[%s3703_s2 + $0xc] sm:$0xf] (!%p493_p9)  ;;  %v1088_v59 = vld [vmem:[%s3703_s2 + $0x10] sm:$0xf] (!%p493_p9)  ;;  %vm2437_vm0 = vcmask (!%p493_p9), 523264  }
  0x41   : > { %v572_v2 = vld [vmem:[%s3159_s27 + $0x8] sm:$0xff] (!%p493_p9)  ;;  %v574_v3 = vld [vmem:[%s3159_s27 + $0x18] sm:$0xff] (!%p493_p9)  ;;  %v571_v4 = vld [vmem:[%s3159_s27] sm:$0xff] (!%p493_p9)  ;;  %1142 = vperm.xlu1 (!%p493_p9), %2764, %v1086_v50   ;;  %s2616_s13 = sshll.u32 (!%p493_p9), %s2884_s15, 1  ;;  %p551_p10 = scmp.lt.s32.totalorder (!%p493_p9), %s2888_s16, 1 }
  0x42   : > { %v636_v5 = vpack.c.bf16 (!%p493_p9), %v574_v3, %v572_v2  ;;  %v573_v6 = vld [vmem:[%s3159_s27 + $0x10] sm:$0xff] (!%p493_p9)  ;;  %v576_v7 = vld [vmem:[%s3159_s27 + $0x28] sm:$0xff] (!%p493_p9)  ;;  %v578_v8 = vld [vmem:[%s3159_s27 + $0x38] sm:$0xff] (!%p493_p9)  ;;  %p553_p11 = scmp.lt.s32.totalorder (!%p493_p9), %s2616_s13, 3 }
  0x43   : > { %v635_v9 = vpack.c.bf16 (!%p493_p9), %v573_v6, %v571_v4  ;;  %v638_v10 = vpack.c.bf16 (!%p493_p9), %v578_v8, %v576_v7  ;;  %v575_v11 = vld [vmem:[%s3159_s27 + $0x20] sm:$0xff] (!%p493_p9)  ;;  %v577_v12 = vld [vmem:[%s3159_s27 + $0x30] sm:$0xff] (!%p493_p9)  ;;  %v580_v13 = vld [vmem:[%s3159_s27 + $0x48] sm:$0xff] (!%p493_p9) }
  0x44   : > { %859 = vmatprep.subr.bf16.mxu0 (!%p493_p9), %v636_v5  ;;  %v582_v14 = vld [vmem:[%s3159_s27 + $0x58] sm:$0xff] (!%p493_p9)  ;;  %v637_v15 = vpack.c.bf16 (!%p493_p9), %v577_v12, %v575_v11  ;;  %v579_v17 = vld [vmem:[%s3159_s27 + $0x40] sm:$0xff] (!%p493_p9)  ;;  %v581_v18 = vld [vmem:[%s3159_s27 + $0x50] sm:$0xff] (!%p493_p9)  ;;  %1130 = vperm.xlu0 (!%p493_p9), %2763, %v1085_v51  }
  0x45   : > { %860 = vmatpush1.bf16.msra.mxu0 (!%p493_p9), %v635_v9  ;;  %v640_v16 = vpack.c.bf16 (!%p493_p9), %v582_v14, %v580_v13  ;;  %v584_v19 = vld [vmem:[%s3159_s27 + $0x68] sm:$0xff] (!%p493_p9)  ;;  %v586_v20 = vld [vmem:[%s3159_s27 + $0x78] sm:$0xff] (!%p493_p9)  ;;  %v639_v21 = vpack.c.bf16 (!%p493_p9), %v581_v18, %v579_v17  ;;  %v583_v23 = vld [vmem:[%s3159_s27 + $0x60] sm:$0xff] (!%p493_p9)  ;;  %1154 = vperm.xlu1 (!%p493_p9), %2764, %v1087_v54  }
  0x46   : > { %861 = vmatprep.subr.bf16.mxu0 %v638_v10  ;;  %v642_v22 = vpack.c.bf16 %v586_v20, %v584_v19  ;;  %v585_v24 = vld [vmem:[%s3159_s27 + $0x70] sm:$0xff]  ;;  %v588_v25 = vld [vmem:[%s3159_s27 + $0x88] sm:$0xff]  ;;  %v590_v26 = vld [vmem:[%s3159_s27 + $0x98] sm:$0xff]  ;;  %s3731_s16 = smov (!%p551_p10, %s2888_s16), 1  ;;  %s3733_s13 = smov (!%p553_p11, %s2616_s13), 3 }
  0x47   : > { %v641_v27 = vpack.c.bf16 %v585_v24, %v583_v23  ;;  %v644_v28 = vpack.c.bf16 %v590_v26, %v588_v25  ;;  %v587_v29 = vld [vmem:[%s3159_s27 + $0x80] sm:$0xff]  ;;  %v589_v30 = vld [vmem:[%s3159_s27 + $0x90] sm:$0xff]  ;;  %v592_v31 = vld [vmem:[%s3159_s27 + $0xa8] sm:$0xff]  ;;  %s2617_s28 = sshll.u32 %s3731_s16, 2 }
  0x48   : > { %v594_v32 = vld [vmem:[%s3159_s27 + $0xb8] sm:$0xff]  ;;  %v643_v33 = vpack.c.bf16 %v589_v30, %v587_v29  ;;  %v591_v35 = vld [vmem:[%s3159_s27 + $0xa0] sm:$0xff]  ;;  %v593_v36 = vld [vmem:[%s3159_s27 + $0xb0] sm:$0xff]  ;;  %1166 = vperm.xlu0 %2763, %v1088_v59   ;;  %s556_s29 = sadd.s32 %s2617_s28, %s3733_s13 }
  0x49   : > { %862 = vmatpush1.bf16.msra.mxu0 %v637_v15  ;;  %v646_v34 = vpack.c.bf16 %v594_v32, %v592_v31  ;;  %v596_v37 = vld [vmem:[%s3159_s27 + $0xc8] sm:$0xff]  ;;  %v598_v38 = vld [vmem:[%s3159_s27 + $0xd8] sm:$0xff]  ;;  %v645_v39 = vpack.c.bf16 %v593_v36, %v591_v35  ;;  %v595_v40 = vld [vmem:[%s3159_s27 + $0xc0] sm:$0xff]  ;;  %s2618_s30 = sshll.u32 %s556_s29, 2 }
  0x4a   : > { %863 = vmatprep.subr.bf16.mxu0 %v640_v16  ;;  %v648_v41 = vpack.c.bf16 %v598_v38, %v596_v37  ;;  %v597_v42 = vld [vmem:[%s3159_s27 + $0xd0] sm:$0xff]  ;;  %v600_v43 = vld [vmem:[%s3159_s27 + $0xe8] sm:$0xff]  ;;  %v602_v44 = vld [vmem:[%s3159_s27 + $0xf8] sm:$0xff]  ;;  %s558_s15 = scalar_lea.vmem %s3710_s9, %s2618_s30  ;;  %s568_s22 = scalar_lea.vmem %s3711_s10, %s2618_s30 }
  0x4b   : > { %v647_v46 = vpack.c.bf16 %v597_v42, %v595_v40  ;;  %v599_v47 = vld [vmem:[%s3159_s27 + $0xe0] sm:$0xff]  ;;  %v650_v48 = vpack.c.bf16 %v602_v44, %v600_v43  ;;  %v601_v49 = vld [vmem:[%s3159_s27 + $0xf0] sm:$0xff]  ;;  %v604_v52 = vld [vmem:[%s3159_s27 + $0x108] sm:$0xff] }
  0x4c   : > { %v606_v53 = vld [vmem:[%s3159_s27 + $0x118] sm:$0xff]  ;;  %v649_v55 = vpack.c.bf16 %v601_v49, %v599_v47  ;;  %v603_v56 = vld [vmem:[%s3159_s27 + $0x100] sm:$0xff]  ;;  %v605_v57 = vld [vmem:[%s3159_s27 + $0x110] sm:$0xff] }
  0x4d   : > { %864 = vmatpush1.bf16.msra.mxu0 %v639_v21  ;;  %v652_v58 = vpack.c.bf16 %v606_v53, %v604_v52  ;;  %v608_v60 = vld [vmem:[%s3159_s27 + $0x128] sm:$0xff]  ;;  %v610_v61 = vld [vmem:[%s3159_s27 + $0x138] sm:$0xff]  ;;  %v1089_v62 = vld [vmem:[%s3703_s2 + $0x14] sm:$0xf]  ;;  %v651_v63 = vpack.c.bf16 %v605_v57, %v603_v56 }
  0x4e   : > { %865 = vmatprep.subr.bf16.mxu0 %v642_v22  ;;  %v654_v0 = vpack.c.bf16 %v610_v61, %v608_v60  ;;  %v607_v2 = vld [vmem:[%s3159_s27 + $0x120] sm:$0xff]  ;;  %v609_v3 = vld [vmem:[%s3159_s27 + $0x130] sm:$0xff]  ;;  %v1090_v4 = vld [vmem:[%s3703_s2 + $0x18] sm:$0xf]  ;;  %1178 = vperm.xlu1 %2764, %v1089_v62  }
  0x4f   : > { %v612_v5 = vld [vmem:[%s3159_s27 + $0x148] sm:$0xff]  ;;  %v614_v6 = vld [vmem:[%s3159_s27 + $0x158] sm:$0xff]  ;;  %v653_v8 = vpack.c.bf16 %v609_v3, %v607_v2  ;;  %v611_v9 = vld [vmem:[%s3159_s27 + $0x140] sm:$0xff]  ;;  %1190 = vperm.xlu0 %2763, %v1090_v4  }
  0x50   : > { %v1091_v7 = vld [vmem:[%s3703_s2 + $0x1c] sm:$0xf]  ;;  %v613_v10 = vld [vmem:[%s3159_s27 + $0x150] sm:$0xff]  ;;  %v656_v11 = vpack.c.bf16 %v614_v6, %v612_v5  ;;  %v1092_v12 = vld [vmem:[%s3703_s2 + $0x20] sm:$0xf] }
  0x51   : > { %866 = vmatpush1.bf16.msra.mxu0 %v641_v27  ;;  %v616_v13 = vld [vmem:[%s3159_s27 + $0x168] sm:$0xff]  ;;  %v618_v14 = vld [vmem:[%s3159_s27 + $0x178] sm:$0xff]  ;;  %v1093_v15 = vld [vmem:[%s3703_s2 + $0x24] sm:$0xf]  ;;  %v655_v16 = vpack.c.bf16 %v613_v10, %v611_v9 }
  0x52   : > { %867 = vmatprep.subr.bf16.mxu0 %v644_v28  ;;  %1202 = vperm.xlu1 %2764, %v1091_v7   ;;  %v658_v17 = vpack.c.bf16 %v618_v14, %v616_v13  ;;  %v615_v18 = vld [vmem:[%s3159_s27 + $0x160] sm:$0xff]  ;;  %v617_v19 = vld [vmem:[%s3159_s27 + $0x170] sm:$0xff]  ;;  %v1094_v20 = vld [vmem:[%s3703_s2 + $0x28] sm:$0xf] }
  0x53   : > { %1214 = vperm.xlu0 %2763, %v1092_v12   ;;  %v620_v21 = vld [vmem:[%s3159_s27 + $0x188] sm:$0xff]  ;;  %v622_v22 = vld [vmem:[%s3159_s27 + $0x198] sm:$0xff]  ;;  %v657_v24 = vpack.c.bf16 %v617_v19, %v615_v18  ;;  %v619_v25 = vld [vmem:[%s3159_s27 + $0x180] sm:$0xff] }
  0x54   : > { %v1095_v23 = vld [vmem:[%s3703_s2 + $0x2c] sm:$0xf]  ;;  %v621_v26 = vld [vmem:[%s3159_s27 + $0x190] sm:$0xff]  ;;  %v660_v27 = vpack.c.bf16 %v622_v22, %v620_v21  ;;  %v626_v30 = vld [vmem:[%s3159_s27 + $0x1b8] sm:$0xff] }
  0x55   : > { %868 = vmatpush1.bf16.msra.mxu0 %v643_v33  ;;  %v1096_v28 = vld [vmem:[%s3703_s2 + $0x30] sm:$0xf]  ;;  %v624_v29 = vld [vmem:[%s3159_s27 + $0x1a8] sm:$0xff]  ;;  %v1097_v31 = vld [vmem:[%s3703_s2 + $0x34] sm:$0xf]  ;;  %v659_v32 = vpack.c.bf16 %v621_v26, %v619_v25 }
  0x56   : > { %869 = vmatprep.subr.bf16.mxu0 %v646_v34  ;;  %1226 = vperm.xlu1 %2764, %v1093_v15   ;;  %v662_v33 = vpack.c.bf16 %v626_v30, %v624_v29  ;;  %v623_v34 = vld [vmem:[%s3159_s27 + $0x1a0] sm:$0xff]  ;;  %v625_v35 = vld [vmem:[%s3159_s27 + $0x1b0] sm:$0xff]  ;;  %v1098_v36 = vld [vmem:[%s3703_s2 + $0x38] sm:$0xf] }
  0x57   : > { %1238 = vperm.xlu0 %2763, %v1094_v20   ;;  %v628_v37 = vld [vmem:[%s3159_s27 + $0x1c8] sm:$0xff]  ;;  %v630_v38 = vld [vmem:[%s3159_s27 + $0x1d8] sm:$0xff]  ;;  %v661_v40 = vpack.c.bf16 %v625_v35, %v623_v34  ;;  %v629_v42 = vld [vmem:[%s3159_s27 + $0x1d0] sm:$0xff] }
  0x58   : > { %v632_v43 = vld [vmem:[%s3159_s27 + $0x1e8] sm:$0xff]  ;;  %v664_v44 = vpack.c.bf16 %v630_v38, %v628_v37  ;;  %v1100_v45 = vld [vmem:[%s3703_s2 + $0x40] sm:$0xf]  ;;  %v1101_v47 = vld [vmem:[%s3703_s2 + $0x44] sm:$0xf] }
  0x59   : > { %870 = vmatpush1.bf16.msra.mxu0 %v645_v39  ;;  %v1099_v39 = vld [vmem:[%s3703_s2 + $0x3c] sm:$0xf]  ;;  %v633_v49 = vld [vmem:[%s3159_s27 + $0x1f0] sm:$0xff]  ;;  %v1102_v50 = vld [vmem:[%s3703_s2 + $0x48] sm:$0xf] }
  0x5a   : > { %871 = vmatprep.subr.bf16.mxu0 %v648_v41  ;;  %1250 = vperm.xlu1 %2764, %v1095_v23   ;;  %v627_v41 = vld [vmem:[%s3159_s27 + $0x1c0] sm:$0xff]  ;;  %v1103_v53 = vld [vmem:[%s3703_s2 + $0x4c] sm:$0xf]  ;;  %v2768_v57 = vld [vmem:[%s3702_s1 + $0x14] ss:$8 sps:$4 sm:$0xff]  }
  0x5b   : > { %1262 = vperm.xlu0 %2763, %v1096_v28   ;;  %v663_v51 = vpack.c.bf16 %v629_v42, %v627_v41  ;;  %v2765_v56 = vld [vmem:[%s3702_s1] ss:$8 sps:$4 sm:$0xff]   ;;  %v1106_v59 = vld [vmem:[%s3703_s2 + $0x58] sm:$0xf]  ;;  %v1107_v60 = vld [vmem:[%s3703_s2 + $0x5c] sm:$0xf] }
  0x5c   : > { %v1108_v61 = vld [vmem:[%s3703_s2 + $0x60] sm:$0xf]  ;;  %v2770_v62 = vld [vmem:[%s3702_s1 + $0x10] ss:$8 sps:$4 sm:$0xff]   ;;  %v1110_v2 = vld [vmem:[%s3703_s2 + $0x68] sm:$0xf] }
  0x5d   : > { %872 = vmatpush1.bf16.msra.mxu0 %v647_v46  ;;  %v634_v46 = vld [vmem:[%s3159_s27 + $0x1f8] sm:$0xff]  ;;  %v1111_v3 = vld [vmem:[%s3703_s2 + $0x6c] sm:$0xf]  ;;  %v1112_v4 = vld [vmem:[%s3703_s2 + $0x70] sm:$0xf] }
  0x5e   : > { %873 = vmatprep.subr.bf16.mxu0 %v650_v48  ;;  %1274 = vperm.xlu1 %2764, %v1097_v31   ;;  %v631_v48 = vld [vmem:[%s3159_s27 + $0x1e0] sm:$0xff]  ;;  %v666_v52 = vpack.c.bf16 %v634_v46, %v632_v43  ;;  %v1113_v6 = vld [vmem:[%s3703_s2 + $0x74] sm:$0xf]  ;;  %v1115_v9 = vld [vmem:[%s3703_s2 + $0x7c] sm:$0xf] }
  0x5f   : > { %1286 = vperm.xlu0 %2763, %v1098_v36   ;;  %v665_v54 = vpack.c.bf16 %v633_v49, %v631_v48  ;;  %v2773_v5 = vld [vmem:[%s3702_s1 + $0x20] ss:$8 sps:$4 sm:$0xff]   ;;  %v2774_v7 = vld [vmem:[%s3702_s1 + $0x34] ss:$8 sps:$4 sm:$0xff]   ;;  %v1886_v12 = vld [vmem:[%s3705_s4 + $0x4] sm:$0xf] }
  0x60   : > { %v1885_v10 = vld [vmem:[%s3705_s4] sm:$0xf]  ;;  %v2777_v13 = vld [vmem:[%s3702_s1 + $0x44] ss:$8 sps:$4 sm:$0xff]   ;;  %v1887_v14 = vld [vmem:[%s3705_s4 + $0x8] sm:$0xf] }
  0x61   : > { %874 = vmatpush1.bf16.msra.mxu0 %v649_v55  ;;  %v1104_v55 = vld [vmem:[%s3703_s2 + $0x50] sm:$0xf]  ;;  %v1888_v15 = vld [vmem:[%s3705_s4 + $0xc] sm:$0xf]  ;;  %v1890_v18 = vld [vmem:[%s3705_s4 + $0x14] sm:$0xf] }
  0x62   : > { %875 = vmatprep.subr.bf16.mxu0 %v652_v58  ;;  %1298 = vperm.xlu1 %2764, %v1099_v39   ;;  %v1105_v58 = vld [vmem:[%s3703_s2 + $0x54] sm:$0xf]  ;;  %v1891_v20 = vld [vmem:[%s3705_s4 + $0x18] sm:$0xf]  ;;  %v1892_v21 = vld [vmem:[%s3705_s4 + $0x1c] sm:$0xf] }
  0x63   : > { %1310 = vperm.xlu0 %2763, %v1100_v45   ;;  %v2780_v19 = vld [vmem:[%s3702_s1 + $0x54] ss:$8 sps:$4 sm:$0xff]   ;;  %v1893_v22 = vld [vmem:[%s3705_s4 + $0x20] sm:$0xf]  ;;  %v2782_v23 = vld [vmem:[%s3702_s1 + $0x50] ss:$8 sps:$4 sm:$0xff]  }
  0x64   : > { %v2783_v25 = vld [vmem:[%s3702_s1 + $0x64] ss:$8 sps:$4 sm:$0xff]   ;;  %v1895_v26 = vld [vmem:[%s3705_s4 + $0x28] sm:$0xf]  ;;  %v1897_v28 = vld [vmem:[%s3705_s4 + $0x30] sm:$0xf] }
  0x65   : > { %876 = vmatpush1.bf16.msra.mxu0 %v651_v63  ;;  %v1109_v63 = vld [vmem:[%s3703_s2 + $0x64] sm:$0xf]  ;;  %v2785_v29 = vld [vmem:[%s3702_s1 + $0x60] ss:$8 sps:$4 sm:$0xff]   ;;  %v1898_v30 = vld [vmem:[%s3705_s4 + $0x34] sm:$0xf] }
  0x66   : > { %877 = vmatprep.subr.bf16.mxu0 %v654_v0  ;;  %1322 = vperm.xlu1 %2764, %v1101_v47   ;;  %v2771_v0 = vld [vmem:[%s3702_s1 + $0x24] ss:$8 sps:$4 sm:$0xff]   ;;  %v2786_v31 = vld [vmem:[%s3702_s1 + $0x74] ss:$8 sps:$4 sm:$0xff]   ;;  %v2286_v34 = vld [vmem:[%s3707_s6] sm:$0xf] }
  0x67   : > { %1334 = vperm.xlu0 %2763, %v1102_v50   ;;  %v2788_v35 = vld [vmem:[%s3702_s1 + $0x70] ss:$8 sps:$4 sm:$0xff]   ;;  %v2287_v36 = vld [vmem:[%s3707_s6 + $0x4] sm:$0xf]  ;;  %v2288_v38 = vld [vmem:[%s3707_s6 + $0x8] sm:$0xf] }
  0x68   : > { %v2789_v37 = vld [vmem:[%s3702_s1 + $0x84] ss:$8 sps:$4 sm:$0xff]   ;;  %v2791_v41 = vld [vmem:[%s3702_s1 + $0x80] ss:$8 sps:$4 sm:$0xff]   ;;  %v2291_v42 = vld [vmem:[%s3707_s6 + $0x14] sm:$0xf] }
  0x69   : > { %878 = vmatpush1.bf16.msra.mxu0 %v653_v8  ;;  %v1114_v8 = vld [vmem:[%s3703_s2 + $0x78] sm:$0xf]  ;;  %v2289_v39 = vld [vmem:[%s3707_s6 + $0xc] sm:$0xf]  ;;  %v2792_v43 = vld [vmem:[%s3702_s1 + $0x94] ss:$8 sps:$4 sm:$0xff]  }
  0x6a   : > { %879 = vmatprep.subr.bf16.mxu0 %v656_v11  ;;  %1346 = vperm.xlu1 %2764, %v1103_v53   ;;  %v2776_v11 = vld [vmem:[%s3702_s1 + $0x30] ss:$8 sps:$4 sm:$0xff]   ;;  %v2293_v45 = vld [vmem:[%s3707_s6 + $0x1c] sm:$0xf]  ;;  %v2431_v46 = vld [vmem:[%s3709_s8] sm:$0x7] }
  0x6b   : > { %1358 = vperm.xlu0 %2763, %v1104_v55   ;;  %v2794_v47 = vld [vmem:[%s3702_s1 + $0x90] ss:$8 sps:$4 sm:$0xff]   ;;  %v2795_v48 = vld [vmem:[%s3702_s1 + $0xa4] ss:$8 sps:$4 sm:$0xff]   ;;  %v2797_v49 = vld [vmem:[%s3702_s1 + $0xa0] ss:$8 sps:$4 sm:$0xff]  }
  0x6c   : > { %v2798_v50 = vld [vmem:[%s3702_s1 + $0xb4] ss:$8 sps:$4 sm:$0xff]   ;;  %v2803_v53 = vld [vmem:[%s3702_s1 + $0xc0] ss:$8 sps:$4 sm:$0xff]   ;;  %v2806_v55 = vld [vmem:[%s3702_s1 + $0xd0] ss:$8 sps:$4 sm:$0xff]  }
  0x6d   : > { %880 = vmatpush1.bf16.msra.mxu0 %v655_v16  ;;  %v1889_v16 = vld [vmem:[%s3705_s4 + $0x10] sm:$0xf] }
  0x6e   : > { %881 = vmatprep.subr.bf16.mxu0 %v658_v17  ;;  %1370 = vperm.xlu1 %2764, %v1105_v58   ;;  %v2779_v17 = vld [vmem:[%s3702_s1 + $0x40] ss:$8 sps:$4 sm:$0xff]   ;;  %v2810_v58 = vld [vmem:[%s3702_s1 + $0xf4] ss:$8 sps:$4 sm:$0xff]  }
  0x6f   : > { %1382 = vperm.xlu0 %2763, %v1106_v59   ;;  %v2812_v59 = vld [vmem:[%s3702_s1 + $0xf0] ss:$8 sps:$4 sm:$0xff]  }
  0x71   : > { %882 = vmatpush1.bf16.msra.mxu0 %v657_v24  ;;  %v1894_v24 = vld [vmem:[%s3705_s4 + $0x24] sm:$0xf] }
  0x72   : > { %883 = vmatprep.subr.bf16.mxu0 %v660_v27  ;;  %1394 = vperm.xlu1 %2764, %v1107_v60   ;;  %v1896_v27 = vld [vmem:[%s3705_s4 + $0x2c] sm:$0xf]  ;;  %v2903_v60 = vmov 839922192  }
  0x73   : > { %1406 = vperm.xlu0 %2763, %v1108_v61   ;;  %v1122_v61 = vunpack.c.l.s4 %v2903_v60 }
  0x75   : > { %884 = vmatpush1.bf16.msra.mxu0 %v659_v32  ;;  %v1899_v32 = vld [vmem:[%s3705_s4 + $0x38] sm:$0xf] }
  0x76   : > { %885 = vmatprep.subr.bf16.mxu0 %v662_v33  ;;  %1418 = vperm.xlu1 %2764, %v1109_v63   ;;  %v1900_v33 = vld [vmem:[%s3705_s4 + $0x3c] sm:$0xf]  ;;  %v1123_v63 = vunpack.c.0.s8 %v1122_v61 }
  0x77   : > { %1430 = vperm.xlu0 %2763, %v1110_v2  }
  0x79   : > { %886 = vmatpush1.bf16.msra.mxu0 %v661_v40  ;;  %v2290_v40 = vld [vmem:[%s3707_s6 + $0x10] sm:$0xf] }
  0x7a   : > { %887 = vmatprep.subr.bf16.mxu0 %v664_v44  ;;  %1442 = vperm.xlu1 %2764, %v1111_v3   ;;  %v2292_v44 = vld [vmem:[%s3707_s6 + $0x18] sm:$0xf] }
  0x7b   : > { %1454 = vperm.xlu0 %2763, %v1112_v4  }
  0x7d   : > { %888 = vmatpush1.bf16.msra.mxu0 %v663_v51  ;;  %v2800_v51 = vld [vmem:[%s3702_s1 + $0xb0] ss:$8 sps:$4 sm:$0xff]  }
  0x7e   : > { %889 = vmatprep.subr.bf16.mxu0 %v666_v52  ;;  %1466 = vperm.xlu1 %2764, %v1113_v6   ;;  %v2801_v52 = vld [vmem:[%s3702_s1 + $0xc4] ss:$8 sps:$4 sm:$0xff]  }
  0x7f   : > { %1478 = vperm.xlu0 %2763, %v1114_v8  }
  0x81   : > { %890 = vmatpush1.bf16.msra.mxu0 %v665_v54  ;;  %v2804_v54 = vld [vmem:[%s3702_s1 + $0xd4] ss:$8 sps:$4 sm:$0xff]  }
  0x82   : > { %1490 = vperm.xlu1 %2764, %v1115_v9  }
  0x83   : > { %1903 = vperm.xlu0 %2763, %v1885_v10  }
  0x84   : > { %892 = vmatmul.mubr.bf16.vlgmr.msra.gmra.mrb[0].mxu0 %v2765_v56  ;;  %v2807_v56 = vld [vmem:[%s3702_s1 + $0xe4] ss:$8 sps:$4 sm:$0xff]  }
  0x85   : > { %901 = vmatprep.mubr.bf16.mxu0 %v2768_v57  ;;  %v2809_v57 = vld [vmem:[%s3702_s1 + $0xe0] ss:$8 sps:$4 sm:$0xff]  }
  0x86   : > { %1915 = vperm.xlu1 %2764, %v1886_v12  }
  0x87   : > { %1927 = vperm.xlu0 %2763, %v1887_v14   ;;  %v2815_v14 = vld [vmem:[%s3704_s3 + $0x4] ss:$8 sps:$4 sm:$0xff]  }
  0x88   : > { %1788 = vmatprep.mubr.bf16.mxu1 %v2815_v14 }
  0x8a   : > { %1939 = vperm.xlu1 %2764, %v1888_v15  }
  0x8b   : > { %1951 = vperm.xlu0 %2763, %v1889_v16  }
  0x8c   : > { %902 = vmatmul.mubr.bf16.gmra.mrb[4].mxu0 %v2770_v62  ;;  %v1124_v62 = vlaneseq }
  0x8d   : > { %911 = vmatprep.mubr.bf16.mxu0 %v2771_v0 }
  0x8e   : > { %1963 = vperm.xlu1 %2764, %v1890_v18   ;;  %v1125_v0 = vshrl.u32 %v1124_v62, 7 }
  0x8f   : > { %1975 = vperm.xlu0 %2763, %v1891_v20  }
  0x90   : > { %v3489_v3 = vsub.s32 %v1123_v63, %v1125_v0 }
  0x92   : > { %1987 = vperm.xlu1 %2764, %v1892_v21  }
  0x93   : > { %1999 = vperm.xlu0 %2763, %v1893_v22  }
  0x94   : > { %912 = vmatmul.mubr.bf16.gmra.mrb[8].mxu0 %v2773_v5 }
  0x95   : > { %921 = vmatprep.mubr.bf16.mxu0 %v2774_v7 }
  0x96   : > { %2011 = vperm.xlu1 %2764, %v1894_v24  }
  0x97   : > { %2023 = vperm.xlu0 %2763, %v1895_v26  }
  0x9a   : > { %2035 = vperm.xlu1 %2764, %v1896_v27  }
  0x9b   : > { %2047 = vperm.xlu0 %2763, %v1897_v28  }
  0x9c   : > { %922 = vmatmul.mubr.bf16.gmra.mrb[12].mxu0 %v2776_v11 }
  0x9d   : > { %931 = vmatprep.mubr.bf16.mxu0 %v2777_v13 }
  0x9e   : > { %2059 = vperm.xlu1 %2764, %v1898_v30  }
  0x9f   : > { %2071 = vperm.xlu0 %2763, %v1899_v32  }
  0xa2   : > { %2083 = vperm.xlu1 %2764, %v1900_v33  }
  0xa3   : > { %2296 = vperm.xlu0 %2763, %v2286_v34  }
  0xa4   : > { %932 = vmatmul.mubr.bf16.gmra.mrb[16].mxu0 %v2779_v17 }
  0xa5   : > { %941 = vmatprep.mubr.bf16.mxu0 %v2780_v19 }
  0xa6   : > { %2308 = vperm.xlu1 %2764, %v2287_v36  }
  0xa7   : > { %2320 = vperm.xlu0 %2763, %v2288_v38  }
  0xaa   : > { %2332 = vperm.xlu1 %2764, %v2289_v39  }
  0xab   : > { %2344 = vperm.xlu0 %2763, %v2290_v40  }
  0xac   : > { %942 = vmatmul.mubr.bf16.gmra.mrb[20].mxu0 %v2782_v23 }
  0xad   : > { %951 = vmatprep.mubr.bf16.mxu0 %v2783_v25 }
  0xae   : > { %2356 = vperm.xlu1 %2764, %v2291_v42  }
  0xaf   : > { %2368 = vperm.xlu0 %2763, %v2292_v44  }
  0xb2   : > { %2380 = vperm.xlu1 %2764, %v2293_v45  }
  0xb3   : > { %2434 = vperm.xlu0 %2763, %v2431_v46  }
  0xb4   : > { %952 = vmatmul.mubr.bf16.gmra.mrb[24].mxu0 %v2785_v29 }
  0xb5   : > { %961 = vmatprep.mubr.bf16.mxu0 %v2786_v31 }
  0xbc   : > { %962 = vmatmul.mubr.bf16.gmra.mrb[28].mxu0 %v2788_v35 }
  0xbd   : > { %971 = vmatprep.mubr.bf16.mxu0 %v2789_v37 }
  0xbf   : > { %v1119_v2 = vpop.permute.xlu0 %1118 }
  0xc0   : > { %v1127_v5 = vrot.slane %v1119_v2, %v3489_v3  ;;  %v1143_v7 = vpop.permute.xlu1 %1142 }
  0xc1   : > { %v1151_v17 = vrot.slane %v1143_v7, %v3489_v3 }
  0xc3   : > { %v1131_v4 = vpop.permute.xlu0 %1130 }
  0xc4   : > { %972 = vmatmul.mubr.bf16.gmra.mrb[32].mxu0 %v2791_v41  ;;  %v1139_v6 = vrot.slane %v1131_v4, %v3489_v3  ;;  %v1155_v15 = vpop.permute.xlu1 %1154 }
  0xc5   : > { %981 = vmatprep.mubr.bf16.mxu0 %v2792_v43  ;;  %v1163_v18 = vrot.slane %v1155_v15, %v3489_v3 }
  0xc6   : > { %v2654_v9 = vcombine.low %v1127_v5, %v1139_v6 }
  0xc7   : > { %v2655_v23 = vcombine.low %v1151_v17, %v1163_v18  ;;  %v1167_v29 = vpop.permute.xlu0 %1166 }
  0xc8   : > { %v1175_v32 = vrot.slane %v1167_v29, %v3489_v3 }
  0xcc   : > { %982 = vmatmul.mubr.bf16.gmra.mrb[36].mxu0 %v2794_v47 }
  0xcd   : > { %991 = vmatprep.mubr.bf16.mxu0 %v2795_v48  ;;  %v1179_v30 = vpop.permute.xlu1 %1178 }
  0xce   : > { %v1187_v33 = vrot.slane %v1179_v30, %v3489_v3  ;;  %v1191_v44 = vpop.permute.xlu0 %1190 }
  0xcf   : > { %v1199_v47 = vrot.slane %v1191_v44, %v3489_v3 }
  0xd0   : > { %v2656_v38 = vcombine.low %v1175_v32, %v1187_v33 }
  0xd1   : > { %v1203_v45 = vpop.permute.xlu1 %1202 }
  0xd2   : > { %v1211_v48 = vrot.slane %v1203_v45, %v3489_v3 }
  0xd4   : > { %992 = vmatmul.mubr.bf16.gmra.mrb[40].mxu0 %v2797_v49 }
  0xd5   : > { %1001 = vmatprep.mubr.bf16.mxu0 %v2798_v50  ;;  %v1227_v60 = vpop.permute.xlu1 %1226 }
  0xd6   : > { %v1235_v63 = vrot.slane %v1227_v60, %v3489_v3 }
  0xdc   : > { %1002 = vmatmul.mubr.bf16.gmra.mrb[44].mxu0 %v2800_v51 }
  0xdd   : > { %1011 = vmatprep.mubr.bf16.mxu0 %v2801_v52 }
  0xe4   : > { %1012 = vmatmul.mubr.bf16.gmra.mrb[48].mxu0 %v2803_v53  ;;  %v2657_v53 = vcombine.low %v1199_v47, %v1211_v48 }
  0xe5   : > { %1021 = vmatprep.mubr.bf16.mxu0 %v2804_v54 }
  0xec   : > { %1022 = vmatmul.mubr.bf16.gmra.mrb[52].mxu0 %v2806_v55 }
  0xed   : > { %1031 = vmatprep.mubr.bf16.mxu0 %v2807_v56 }
  0xf4   : > { %1032 = vmatmul.mubr.bf16.gmra.mrb[56].mxu0 %v2809_v57 }
  0xf5   : > { %1041 = vmatprep.mubr.bf16.mxu0 %v2810_v58 }
  0xfc   : > { %1042 = vmatmul.mubr.bf16.gmra.mrb[60].mxu0 %v2812_v59  ;;  %v1215_v59 = vpop.permute.xlu0 %1214 }
  0xfd   : > { %v1223_v62 = vrot.slane %v1215_v59, %v3489_v3 }
  0xff   : > { %v2658_v6 = vcombine.low %v1223_v62, %v1235_v63 }
 0x157   : > { %v893_v8 = vpop.f32.mrb[0].mxu0 }
 0x158   : > { %v895_v10 = vpop.f32.mrb[1].mxu0 }
 0x159   : > { %v897_v11 = vpop.f32.mrb[2].mxu0 }
 0x15a   : > { %v1052_v12 = vpack.c.bf16 %v897_v11, %v893_v8  ;;  %v899_v13 = vpop.f32.mrb[3].mxu0 }
 0x15b   : > { %v1053_v16 = vpack.c.bf16 %v899_v13, %v895_v10  ;;  %v1251_v13 = vpop.permute.xlu1 %1250 }
 0x15c   : > { %v1596_v19 = vadd.bf16 %v2654_v9, %v1052_v12  ;;  %v1239_v12 = vpop.permute.xlu0 %1238 }
 0x15d   : > { %v1597_v20 = vadd.bf16 %v2654_v9, %v1053_v16  ;;  %v1247_v15 = vrot.slane %v1239_v12, %v3489_v3  ;;  %v1259_v16 = vrot.slane %v1251_v13, %v3489_v3 }
 0x15e   : > { %v1628_v25 = vmax.bf16 %v2902_v1, %v1596_v19 }
 0x15f   : > { %v903_v21 = vpop.f32.mrb[4].mxu0  ;;  %v1629_v22 = vmax.bf16 %v2902_v1, %v1597_v20 }
 0x160   : > { %v905_v24 = vpop.f32.mrb[5].mxu0 }
 0x161   : > { %v907_v26 = vpop.f32.mrb[6].mxu0  ;;  %1756 = vmatprep.subr.bf16.mxu1 %v1629_v22 }
 0x162   : > { %v1054_v27 = vpack.c.bf16 %v907_v26, %v903_v21  ;;  %v909_v28 = vpop.f32.mrb[7].mxu0  ;;  %1757 = vmatpush1.bf16.msra.mxu1 %v1628_v25  ;;  %v2659_v21 = vcombine.low %v1247_v15, %v1259_v16 }
 0x163   : > { %v1055_v31 = vpack.c.bf16 %v909_v28, %v905_v24  ;;  %v1275_v28 = vpop.permute.xlu1 %1274 }
 0x164   : > { %v1598_v34 = vadd.bf16 %v2655_v23, %v1054_v27  ;;  %v1263_v27 = vpop.permute.xlu0 %1262 }
 0x165   : > { %v1599_v35 = vadd.bf16 %v2655_v23, %v1055_v31  ;;  %v1271_v30 = vrot.slane %v1263_v27, %v3489_v3  ;;  %v1283_v31 = vrot.slane %v1275_v28, %v3489_v3 }
 0x166   : > { %v1630_v40 = vmax.bf16 %v2902_v1, %v1598_v34 }
 0x167   : > { %v913_v36 = vpop.f32.mrb[8].mxu0  ;;  %v1631_v37 = vmax.bf16 %v2902_v1, %v1599_v35 }
 0x168   : > { %v915_v39 = vpop.f32.mrb[9].mxu0 }
 0x169   : > { %v917_v41 = vpop.f32.mrb[10].mxu0  ;;  %1758 = vmatprep.subr.bf16.mxu1 %v1631_v37 }
 0x16a   : > { %v1056_v42 = vpack.c.bf16 %v917_v41, %v913_v36  ;;  %v919_v43 = vpop.f32.mrb[11].mxu0  ;;  %1759 = vmatpush1.bf16.msra.mxu1 %v1630_v40  ;;  %v2660_v36 = vcombine.low %v1271_v30, %v1283_v31 }
 0x16b   : > { %v1057_v46 = vpack.c.bf16 %v919_v43, %v915_v39  ;;  %v1299_v43 = vpop.permute.xlu1 %1298 }
 0x16c   : > { %v1600_v49 = vadd.bf16 %v2656_v38, %v1056_v42  ;;  %v1287_v42 = vpop.permute.xlu0 %1286 }
 0x16d   : > { %v1601_v50 = vadd.bf16 %v2656_v38, %v1057_v46  ;;  %v1295_v45 = vrot.slane %v1287_v42, %v3489_v3  ;;  %v1307_v46 = vrot.slane %v1299_v43, %v3489_v3 }
 0x16e   : > { %v1632_v55 = vmax.bf16 %v2902_v1, %v1600_v49 }
 0x16f   : > { %v923_v51 = vpop.f32.mrb[12].mxu0  ;;  %v1633_v52 = vmax.bf16 %v2902_v1, %v1601_v50  ;;  %v1323_v60 = vpop.permute.xlu1 %1322 }
 0x170   : > { %v925_v54 = vpop.f32.mrb[13].mxu0  ;;  %v1311_v59 = vpop.permute.xlu0 %1310  ;;  %v1331_v63 = vrot.slane %v1323_v60, %v3489_v3 }
 0x171   : > { %v927_v56 = vpop.f32.mrb[14].mxu0  ;;  %1760 = vmatprep.subr.bf16.mxu1 %v1633_v52  ;;  %v1319_v62 = vrot.slane %v1311_v59, %v3489_v3 }
 0x172   : > { %v1058_v57 = vpack.c.bf16 %v927_v56, %v923_v51  ;;  %v929_v58 = vpop.f32.mrb[15].mxu0  ;;  %1761 = vmatpush1.bf16.msra.mxu1 %v1632_v55  ;;  %v2661_v51 = vcombine.low %v1295_v45, %v1307_v46 }
 0x173   : > { %v1059_v61 = vpack.c.bf16 %v929_v58, %v925_v54  ;;  %v1347_v13 = vpop.permute.xlu1 %1346 }
 0x174   : > { %v1602_v0 = vadd.bf16 %v2657_v53, %v1058_v57  ;;  %v1335_v12 = vpop.permute.xlu0 %1334  ;;  %v1355_v16 = vrot.slane %v1347_v13, %v3489_v3 }
 0x175   : > { %v1603_v2 = vadd.bf16 %v2657_v53, %v1059_v61  ;;  %v1343_v15 = vrot.slane %v1335_v12, %v3489_v3 }
 0x176   : > { %v1634_v8 = vmax.bf16 %v2902_v1, %v1602_v0 }
 0x177   : > { %v933_v4 = vpop.f32.mrb[16].mxu0  ;;  %v1635_v5 = vmax.bf16 %v2902_v1, %v1603_v2  ;;  %v1371_v28 = vpop.permute.xlu1 %1370 }
 0x178   : > { %v935_v7 = vpop.f32.mrb[17].mxu0  ;;  %v1359_v27 = vpop.permute.xlu0 %1358  ;;  %v1379_v31 = vrot.slane %v1371_v28, %v3489_v3 }
 0x179   : > { %v937_v9 = vpop.f32.mrb[18].mxu0  ;;  %1762 = vmatprep.subr.bf16.mxu1 %v1635_v5  ;;  %v1367_v30 = vrot.slane %v1359_v27, %v3489_v3 }
 0x17a   : > { %v1060_v10 = vpack.c.bf16 %v937_v9, %v933_v4  ;;  %v939_v11 = vpop.f32.mrb[19].mxu0  ;;  %1763 = vmatpush1.bf16.msra.mxu1 %v1634_v8 }
 0x17b   : > { %v1061_v14 = vpack.c.bf16 %v939_v11, %v935_v7  ;;  %v2662_v7 = vcombine.low %v1319_v62, %v1331_v63  ;;  %v1395_v43 = vpop.permute.xlu1 %1394 }
 0x17c   : > { %v1604_v17 = vadd.bf16 %v2658_v6, %v1060_v10  ;;  %v1383_v42 = vpop.permute.xlu0 %1382  ;;  %v1403_v46 = vrot.slane %v1395_v43, %v3489_v3 }
 0x17d   : > { %v1605_v18 = vadd.bf16 %v2658_v6, %v1061_v14  ;;  %v1391_v45 = vrot.slane %v1383_v42, %v3489_v3 }
 0x17e   : > { %v1636_v23 = vmax.bf16 %v2902_v1, %v1604_v17 }
 0x17f   : > { %v943_v19 = vpop.f32.mrb[20].mxu0  ;;  %v1637_v20 = vmax.bf16 %v2902_v1, %v1605_v18 }
 0x180   : > { %v945_v22 = vpop.f32.mrb[21].mxu0 }
 0x181   : > { %v947_v24 = vpop.f32.mrb[22].mxu0  ;;  %1764 = vmatprep.subr.bf16.mxu1 %v1637_v20 }
 0x182   : > { %v1062_v25 = vpack.c.bf16 %v947_v24, %v943_v19  ;;  %v949_v26 = vpop.f32.mrb[23].mxu0  ;;  %1765 = vmatpush1.bf16.msra.mxu1 %v1636_v23 }
 0x183   : > { %v1063_v29 = vpack.c.bf16 %v949_v26, %v945_v22  ;;  %v2663_v22 = vcombine.low %v1343_v15, %v1355_v16 }
 0x184   : > { %v1606_v32 = vadd.bf16 %v2659_v21, %v1062_v25 }
 0x185   : > { %v1607_v33 = vadd.bf16 %v2659_v21, %v1063_v29 }
 0x186   : > { %v1638_v38 = vmax.bf16 %v2902_v1, %v1606_v32 }
 0x187   : > { %v953_v34 = vpop.f32.mrb[24].mxu0  ;;  %v1639_v35 = vmax.bf16 %v2902_v1, %v1607_v33 }
 0x188   : > { %v955_v37 = vpop.f32.mrb[25].mxu0 }
 0x189   : > { %v957_v39 = vpop.f32.mrb[26].mxu0  ;;  %1766 = vmatprep.subr.bf16.mxu1 %v1639_v35 }
 0x18a   : > { %v1064_v40 = vpack.c.bf16 %v957_v39, %v953_v34  ;;  %v959_v41 = vpop.f32.mrb[27].mxu0  ;;  %1767 = vmatpush1.bf16.msra.mxu1 %v1638_v38 }
 0x18b   : > { %v1065_v44 = vpack.c.bf16 %v959_v41, %v955_v37  ;;  %v2664_v37 = vcombine.low %v1367_v30, %v1379_v31 }
 0x18c   : > { %v1608_v47 = vadd.bf16 %v2660_v36, %v1064_v40 }
 0x18d   : > { %v1609_v48 = vadd.bf16 %v2660_v36, %v1065_v44 }
 0x18e   : > { %v1640_v53 = vmax.bf16 %v2902_v1, %v1608_v47 }
 0x18f   : > { %v963_v49 = vpop.f32.mrb[28].mxu0  ;;  %v1641_v50 = vmax.bf16 %v2902_v1, %v1609_v48 }
 0x190   : > { %v965_v52 = vpop.f32.mrb[29].mxu0 }
 0x191   : > { %v967_v54 = vpop.f32.mrb[30].mxu0  ;;  %1768 = vmatprep.subr.bf16.mxu1 %v1641_v50 }
 0x192   : > { %v1066_v55 = vpack.c.bf16 %v967_v54, %v963_v49  ;;  %v969_v56 = vpop.f32.mrb[31].mxu0  ;;  %1769 = vmatpush1.bf16.msra.mxu1 %v1640_v53 }
 0x193   : > { %v1067_v57 = vpack.c.bf16 %v969_v56, %v965_v52  ;;  %v2665_v52 = vcombine.low %v1391_v45, %v1403_v46 }
 0x194   : > { %v1610_v58 = vadd.bf16 %v2661_v51, %v1066_v55 }
 0x195   : > { %v1611_v61 = vadd.bf16 %v2661_v51, %v1067_v57  ;;  %v1407_v57 = vpop.permute.xlu0 %1406 }
 0x196   : > { %v1642_v5 = vmax.bf16 %v2902_v1, %v1610_v58  ;;  %v1419_v58 = vpop.permute.xlu1 %1418  ;;  %v1415_v60 = vrot.slane %v1407_v57, %v3489_v3 }
 0x197   : > { %v973_v0 = vpop.f32.mrb[32].mxu0  ;;  %v1643_v2 = vmax.bf16 %v2902_v1, %v1611_v61  ;;  %v1427_v61 = vrot.slane %v1419_v58, %v3489_v3  ;;  %v2813_v58 = vld [vmem:[%s3704_s3] ss:$8 sps:$4 sm:$0xff]  }
 0x198   : > { %v975_v4 = vpop.f32.mrb[33].mxu0 }
 0x199   : > { %v977_v6 = vpop.f32.mrb[34].mxu0  ;;  %1770 = vmatprep.subr.bf16.mxu1 %v1643_v2 }
 0x19a   : > { %v1068_v8 = vpack.c.bf16 %v977_v6, %v973_v0  ;;  %v979_v9 = vpop.f32.mrb[35].mxu0  ;;  %1771 = vmatpush1.bf16.msra.mxu1 %v1642_v5  ;;  %v2666_v5 = vcombine.low %v1415_v60, %v1427_v61  ;;  %v2818_v60 = vld [vmem:[%s3704_s3 + $0x10] ss:$8 sps:$4 sm:$0xff]   ;;  %v2819_v61 = vld [vmem:[%s3704_s3 + $0x24] ss:$8 sps:$4 sm:$0xff]  }
 0x19b   : > { %v1069_v10 = vpack.c.bf16 %v979_v9, %v975_v4 }
 0x19c   : > { %v1612_v11 = vadd.bf16 %v2662_v7, %v1068_v8 }
 0x19d   : > { %v1613_v14 = vadd.bf16 %v2662_v7, %v1069_v10  ;;  %v1431_v10 = vpop.permute.xlu0 %1430 }
 0x19e   : > { %v1644_v20 = vmax.bf16 %v2902_v1, %v1612_v11  ;;  %v1443_v11 = vpop.permute.xlu1 %1442  ;;  %v1439_v13 = vrot.slane %v1431_v10, %v3489_v3  ;;  %v2836_v10 = vld [vmem:[%s3704_s3 + $0x70] ss:$8 sps:$4 sm:$0xff]  }
 0x19f   : > { %v983_v17 = vpop.f32.mrb[36].mxu0  ;;  %v1645_v18 = vmax.bf16 %v2902_v1, %v1613_v14  ;;  %v1451_v14 = vrot.slane %v1443_v11, %v3489_v3 }
 0x1a0   : > { %v985_v19 = vpop.f32.mrb[37].mxu0 }
 0x1a1   : > { %v987_v21 = vpop.f32.mrb[38].mxu0  ;;  %1772 = vmatprep.subr.bf16.mxu1 %v1645_v18 }
 0x1a2   : > { %v1070_v23 = vpack.c.bf16 %v987_v21, %v983_v17  ;;  %v989_v24 = vpop.f32.mrb[39].mxu0  ;;  %1773 = vmatpush1.bf16.msra.mxu1 %v1644_v20  ;;  %v2667_v20 = vcombine.low %v1439_v13, %v1451_v14 }
 0x1a3   : > { %v1071_v25 = vpack.c.bf16 %v989_v24, %v985_v19 }
 0x1a4   : > { %v1614_v26 = vadd.bf16 %v2663_v22, %v1070_v23 }
 0x1a5   : > { %v1615_v29 = vadd.bf16 %v2663_v22, %v1071_v25  ;;  %v1455_v25 = vpop.permute.xlu0 %1454 }
 0x1a6   : > { %v1646_v35 = vmax.bf16 %v2902_v1, %v1614_v26  ;;  %v1467_v26 = vpop.permute.xlu1 %1466  ;;  %v1463_v28 = vrot.slane %v1455_v25, %v3489_v3 }
 0x1a7   : > { %v993_v32 = vpop.f32.mrb[40].mxu0  ;;  %v1647_v33 = vmax.bf16 %v2902_v1, %v1615_v29  ;;  %v1475_v29 = vrot.slane %v1467_v26, %v3489_v3 }
 0x1a8   : > { %v995_v34 = vpop.f32.mrb[41].mxu0 }
 0x1a9   : > { %v997_v36 = vpop.f32.mrb[42].mxu0  ;;  %1774 = vmatprep.subr.bf16.mxu1 %v1647_v33 }
 0x1aa   : > { %v1072_v38 = vpack.c.bf16 %v997_v36, %v993_v32  ;;  %v999_v39 = vpop.f32.mrb[43].mxu0  ;;  %1775 = vmatpush1.bf16.msra.mxu1 %v1646_v35  ;;  %v2668_v35 = vcombine.low %v1463_v28, %v1475_v29 }
 0x1ab   : > { %v1073_v40 = vpack.c.bf16 %v999_v39, %v995_v34 }
 0x1ac   : > { %v1616_v41 = vadd.bf16 %v2664_v37, %v1072_v38 }
 0x1ad   : > { %v1617_v44 = vadd.bf16 %v2664_v37, %v1073_v40  ;;  %v1479_v40 = vpop.permute.xlu0 %1478 }
 0x1ae   : > { %v1648_v50 = vmax.bf16 %v2902_v1, %v1616_v41  ;;  %v1491_v41 = vpop.permute.xlu1 %1490  ;;  %v1487_v43 = vrot.slane %v1479_v40, %v3489_v3 }
 0x1af   : > { %v1003_v47 = vpop.f32.mrb[44].mxu0  ;;  %v1649_v48 = vmax.bf16 %v2902_v1, %v1617_v44  ;;  %v1499_v44 = vrot.slane %v1491_v41, %v3489_v3 }
 0x1b0   : > { %v1005_v49 = vpop.f32.mrb[45].mxu0 }
 0x1b1   : > { %v1007_v51 = vpop.f32.mrb[46].mxu0  ;;  %1776 = vmatprep.subr.bf16.mxu1 %v1649_v48  ;;  %v1904_v11 = vpop.permute.xlu0 %1903 }
 0x1b2   : > { %v1074_v53 = vpack.c.bf16 %v1007_v51, %v1003_v47  ;;  %v1009_v54 = vpop.f32.mrb[47].mxu0  ;;  %1777 = vmatpush1.bf16.msra.mxu1 %v1648_v50  ;;  %v2669_v50 = vcombine.low %v1487_v43, %v1499_v44  ;;  %v1912_v13 = vrot.slane %v1904_v11, %v3489_v3 }
 0x1b3   : > { %v1075_v55 = vpack.c.bf16 %v1009_v54, %v1005_v49 }
 0x1b4   : > { %v1618_v56 = vadd.bf16 %v2665_v52, %v1074_v53 }
 0x1b5   : > { %v1619_v59 = vadd.bf16 %v2665_v52, %v1075_v55 }
 0x1b6   : > { %v1650_v2 = vmax.bf16 %v2902_v1, %v1618_v56 }
 0x1b7   : > { %v1013_v62 = vpop.f32.mrb[48].mxu0  ;;  %v1651_v63 = vmax.bf16 %v2902_v1, %v1619_v59  ;;  %v2816_v59 = vld [vmem:[%s3704_s3 + $0x14] ss:$8 sps:$4 sm:$0xff]  }
 0x1b8   : > { %v1015_v0 = vpop.f32.mrb[49].mxu0 }
 0x1b9   : > { %v1017_v4 = vpop.f32.mrb[50].mxu0  ;;  %1778 = vmatprep.subr.bf16.mxu1 %v1651_v63  ;;  %v2822_v63 = vld [vmem:[%s3704_s3 + $0x34] ss:$8 sps:$4 sm:$0xff]  }
 0x1ba   : > { %v1076_v6 = vpack.c.bf16 %v1017_v4, %v1013_v62  ;;  %v1019_v7 = vpop.f32.mrb[51].mxu0  ;;  %1779 = vmatpush1.bf16.msra.mxu1 %v1650_v2  ;;  %v2821_v62 = vld [vmem:[%s3704_s3 + $0x20] ss:$8 sps:$4 sm:$0xff]   ;;  %v2825_v2 = vld [vmem:[%s3704_s3 + $0x44] ss:$8 sps:$4 sm:$0xff]  }
 0x1bb   : > { %v1077_v8 = vpack.c.bf16 %v1019_v7, %v1015_v0  ;;  %v2824_v0 = vld [vmem:[%s3704_s3 + $0x30] ss:$8 sps:$4 sm:$0xff]   ;;  %v2827_v4 = vld [vmem:[%s3704_s3 + $0x40] ss:$8 sps:$4 sm:$0xff]   ;;  %v2831_v7 = vld [vmem:[%s3704_s3 + $0x64] ss:$8 sps:$4 sm:$0xff]  }
 0x1bc   : > { %v1620_v9 = vadd.bf16 %v2666_v5, %v1076_v6  ;;  %v2830_v6 = vld [vmem:[%s3704_s3 + $0x50] ss:$8 sps:$4 sm:$0xff]  }
 0x1bd   : > { %v1621_v12 = vadd.bf16 %v2666_v5, %v1077_v8  ;;  %v2828_v5 = vld [vmem:[%s3704_s3 + $0x54] ss:$8 sps:$4 sm:$0xff]   ;;  %v2833_v8 = vld [vmem:[%s3704_s3 + $0x60] ss:$8 sps:$4 sm:$0xff]  }
 0x1be   : > { %v1652_v18 = vmax.bf16 %v2902_v1, %v1620_v9  ;;  %v2834_v9 = vld [vmem:[%s3704_s3 + $0x74] ss:$8 sps:$4 sm:$0xff]  }
 0x1bf   : > { %v1023_v15 = vpop.f32.mrb[52].mxu0  ;;  %v1653_v16 = vmax.bf16 %v2902_v1, %v1621_v12  ;;  %v1916_v12 = vpop.permute.xlu1 %1915 }
 0x1c0   : > { %v1025_v17 = vpop.f32.mrb[53].mxu0  ;;  %v1924_v14 = vrot.slane %v1916_v12, %v3489_v3 }
 0x1c1   : > { %v1027_v19 = vpop.f32.mrb[54].mxu0  ;;  %1780 = vmatprep.subr.bf16.mxu1 %v1653_v16 }
 0x1c2   : > { %v1078_v21 = vpack.c.bf16 %v1027_v19, %v1023_v15  ;;  %v1029_v22 = vpop.f32.mrb[55].mxu0  ;;  %1781 = vmatpush1.bf16.msra.mxu1 %v1652_v18  ;;  %v2686_v18 = vcombine.low %v1912_v13, %v1924_v14 }
 0x1c3   : > { %v1079_v23 = vpack.c.bf16 %v1029_v22, %v1025_v17 }
 0x1c4   : > { %v1622_v24 = vadd.bf16 %v2667_v20, %v1078_v21 }
 0x1c5   : > { %v1623_v27 = vadd.bf16 %v2667_v20, %v1079_v23  ;;  %v1928_v23 = vpop.permute.xlu0 %1927 }
 0x1c6   : > { %v1654_v33 = vmax.bf16 %v2902_v1, %v1622_v24  ;;  %v1940_v24 = vpop.permute.xlu1 %1939  ;;  %v1936_v26 = vrot.slane %v1928_v23, %v3489_v3 }
 0x1c7   : > { %v1033_v30 = vpop.f32.mrb[56].mxu0  ;;  %v1655_v31 = vmax.bf16 %v2902_v1, %v1623_v27  ;;  %v1948_v27 = vrot.slane %v1940_v24, %v3489_v3 }
 0x1c8   : > { %v1035_v32 = vpop.f32.mrb[57].mxu0 }
 0x1c9   : > { %v1037_v34 = vpop.f32.mrb[58].mxu0  ;;  %1782 = vmatprep.subr.bf16.mxu1 %v1655_v31 }
 0x1ca   : > { %v1080_v36 = vpack.c.bf16 %v1037_v34, %v1033_v30  ;;  %v1039_v37 = vpop.f32.mrb[59].mxu0  ;;  %1783 = vmatpush1.bf16.msra.mxu1 %v1654_v33  ;;  %v2687_v33 = vcombine.low %v1936_v26, %v1948_v27 }
 0x1cb   : > { %v1081_v38 = vpack.c.bf16 %v1039_v37, %v1035_v32 }
 0x1cc   : > { %v1624_v39 = vadd.bf16 %v2668_v35, %v1080_v36 }
 0x1cd   : > { %v1625_v42 = vadd.bf16 %v2668_v35, %v1081_v38  ;;  %v1952_v38 = vpop.permute.xlu0 %1951 }
 0x1ce   : > { %v1656_v48 = vmax.bf16 %v2902_v1, %v1624_v39  ;;  %v1964_v39 = vpop.permute.xlu1 %1963  ;;  %v1960_v41 = vrot.slane %v1952_v38, %v3489_v3 }
 0x1cf   : > { %v1043_v45 = vpop.f32.mrb[60].mxu0  ;;  %v1657_v46 = vmax.bf16 %v2902_v1, %v1625_v42  ;;  %v1972_v42 = vrot.slane %v1964_v39, %v3489_v3 }
 0x1d0   : > { %v1045_v47 = vpop.f32.mrb[61].mxu0 }
 0x1d1   : > { %v1047_v49 = vpop.f32.mrb[62].mxu0  ;;  %1784 = vmatprep.subr.bf16.mxu1 %v1657_v46 }
 0x1d2   : > { %v1082_v51 = vpack.c.bf16 %v1047_v49, %v1043_v45  ;;  %v1049_v52 = vpop.f32.mrb[63].mxu0  ;;  %1785 = vmatpush1.bf16.msra.mxu1 %v1656_v48  ;;  %v2688_v48 = vcombine.low %v1960_v41, %v1972_v42 }
 0x1d3   : > { %v1083_v53 = vpack.c.bf16 %v1049_v52, %v1045_v47 }
 0x1d4   : > { %v1626_v54 = vadd.bf16 %v2669_v50, %v1082_v51 }
 0x1d5   : > { %v1627_v55 = vadd.bf16 %v2669_v50, %v1083_v53  ;;  %v1976_v53 = vpop.permute.xlu0 %1975 }
 0x1d6   : > { %v1658_v57 = vmax.bf16 %v2902_v1, %v1626_v54  ;;  %v1988_v54 = vpop.permute.xlu1 %1987 }
 0x1d7   : > { %v1659_v56 = vmax.bf16 %v2902_v1, %v1627_v55 }
 0x1d9   : > { %1786 = vmatprep.subr.bf16.mxu1 %v1659_v56  ;;  %v1984_v56 = vrot.slane %v1976_v53, %v3489_v3 }
 0x1da   : > { %1787 = vmatpush1.bf16.msra.mxu1 %v1658_v57  ;;  %v1996_v57 = vrot.slane %v1988_v54, %v3489_v3 }
 0x1dd   : > { %1789 = vmatmul.mubr.bf16.vlgmr.msra.gmra.mrb[0].mxu1 %v2813_v58 }
 0x1de   : > { %1798 = vmatprep.mubr.bf16.mxu1 %v2816_v59 }
 0x1e5   : > { %1799 = vmatmul.mubr.bf16.gmra.mrb[4].mxu1 %v2818_v60 }
 0x1e6   : > { %1808 = vmatprep.mubr.bf16.mxu1 %v2819_v61 }
 0x1ed   : > { %1809 = vmatmul.mubr.bf16.gmra.mrb[8].mxu1 %v2821_v62 }
 0x1ee   : > { %1818 = vmatprep.mubr.bf16.mxu1 %v2822_v63  ;;  %v2689_v63 = vcombine.low %v1984_v56, %v1996_v57 }
 0x1f5   : > { %1819 = vmatmul.mubr.bf16.gmra.mrb[12].mxu1 %v2824_v0 }
 0x1f6   : > { %1828 = vmatprep.mubr.bf16.mxu1 %v2825_v2 }
 0x1fd   : > { %1829 = vmatmul.mubr.bf16.gmra.mrb[16].mxu1 %v2827_v4 }
 0x1fe   : > { %1838 = vmatprep.mubr.bf16.mxu1 %v2828_v5 }
 0x205   : > { %1839 = vmatmul.mubr.bf16.gmra.mrb[20].mxu1 %v2830_v6  ;;  %v2000_v6 = vpop.permute.xlu0 %1999 }
 0x206   : > { %1848 = vmatprep.mubr.bf16.mxu1 %v2831_v7  ;;  %v2012_v7 = vpop.permute.xlu1 %2011 }
 0x20d   : > { %1849 = vmatmul.mubr.bf16.gmra.mrb[24].mxu1 %v2833_v8 }
 0x20e   : > { %1858 = vmatprep.mubr.bf16.mxu1 %v2834_v9  ;;  %v2008_v9 = vrot.slane %v2000_v6, %v3489_v3 }
 0x215   : > { %1859 = vmatmul.mubr.bf16.gmra.mrb[28].mxu1 %v2836_v10  ;;  %v2020_v10 = vrot.slane %v2012_v7, %v3489_v3  ;;  %v2837_v7 = vld [vmem:[%s3706_s5] sm:$0xff]  }
 0x216   : > { %2237 = vmatprep.mubr.bf16.mxu1 %v2902_v1 }
 0x2b0   : > { %v1790_v15 = vpop.f32.mrb[0].mxu1 }
 0x2b1   : > { %v1792_v16 = vpop.f32.mrb[1].mxu1 }
 0x2b2   : > { %v1794_v17 = vpop.f32.mrb[2].mxu1 }
 0x2b3   : > { %v1869_v19 = vpack.c.bf16 %v1794_v17, %v1790_v15  ;;  %v1796_v20 = vpop.f32.mrb[3].mxu1 }
 0x2b4   : > { %v1870_v21 = vpack.c.bf16 %v1796_v20, %v1792_v16  ;;  %v2690_v16 = vcombine.low %v2008_v9, %v2020_v10  ;;  %v2839_v9 = vld [vmem:[%s3706_s5 + $0x10] sm:$0xff]   ;;  %v2840_v10 = vld [vmem:[%s3706_s5 + $0x18] sm:$0xff]  }
 0x2b5   : > { %v2141_v22 = vadd.bf16 %v2686_v18, %v1869_v19 }
 0x2b6   : > { %v2142_v25 = vadd.bf16 %v2686_v18, %v1870_v21  ;;  %v2024_v21 = vpop.permute.xlu0 %2023 }
 0x2b7   : > { %v2157_v30 = vmax.bf16 %v2902_v1, %v2141_v22  ;;  %v2036_v22 = vpop.permute.xlu1 %2035  ;;  %v2032_v24 = vrot.slane %v2024_v21, %v3489_v3 }
 0x2b8   : > { %v1800_v28 = vpop.f32.mrb[4].mxu1  ;;  %v2158_v29 = vmax.bf16 %v2902_v1, %v2142_v25  ;;  %v2044_v25 = vrot.slane %v2036_v22, %v3489_v3 }
 0x2b9   : > { %v1802_v31 = vpop.f32.mrb[5].mxu1 }
 0x2ba   : > { %v1804_v32 = vpop.f32.mrb[6].mxu1  ;;  %2205 = vmatprep.subr.bf16.mxu1 %v2158_v29 }
 0x2bb   : > { %v1871_v34 = vpack.c.bf16 %v1804_v32, %v1800_v28  ;;  %v1806_v35 = vpop.f32.mrb[7].mxu1  ;;  %2206 = vmatpush1.bf16.msra.mxu1 %v2157_v30 }
 0x2bc   : > { %v1872_v36 = vpack.c.bf16 %v1806_v35, %v1802_v31  ;;  %v2691_v31 = vcombine.low %v2032_v24, %v2044_v25 }
 0x2bd   : > { %v2143_v37 = vadd.bf16 %v2687_v33, %v1871_v34 }
 0x2be   : > { %v2144_v40 = vadd.bf16 %v2687_v33, %v1872_v36  ;;  %v2048_v36 = vpop.permute.xlu0 %2047 }
 0x2bf   : > { %v2159_v45 = vmax.bf16 %v2902_v1, %v2143_v37  ;;  %v2060_v37 = vpop.permute.xlu1 %2059  ;;  %v2056_v39 = vrot.slane %v2048_v36, %v3489_v3 }
 0x2c0   : > { %v1810_v43 = vpop.f32.mrb[8].mxu1  ;;  %v2160_v44 = vmax.bf16 %v2902_v1, %v2144_v40  ;;  %v2068_v40 = vrot.slane %v2060_v37, %v3489_v3 }
 0x2c1   : > { %v1812_v46 = vpop.f32.mrb[9].mxu1 }
 0x2c2   : > { %v1814_v47 = vpop.f32.mrb[10].mxu1  ;;  %2207 = vmatprep.subr.bf16.mxu1 %v2160_v44 }
 0x2c3   : > { %v1873_v49 = vpack.c.bf16 %v1814_v47, %v1810_v43  ;;  %v1816_v50 = vpop.f32.mrb[11].mxu1  ;;  %2208 = vmatpush1.bf16.msra.mxu1 %v2159_v45 }
 0x2c4   : > { %v1874_v51 = vpack.c.bf16 %v1816_v50, %v1812_v46  ;;  %v2692_v46 = vcombine.low %v2056_v39, %v2068_v40 }
 0x2c5   : > { %v2145_v52 = vadd.bf16 %v2688_v48, %v1873_v49 }
 0x2c6   : > { %v2146_v55 = vadd.bf16 %v2688_v48, %v1874_v51  ;;  %v2072_v51 = vpop.permute.xlu0 %2071 }
 0x2c7   : > { %v2161_v60 = vmax.bf16 %v2902_v1, %v2145_v52  ;;  %v2084_v52 = vpop.permute.xlu1 %2083  ;;  %v2080_v54 = vrot.slane %v2072_v51, %v3489_v3 }
 0x2c8   : > { %v1820_v58 = vpop.f32.mrb[12].mxu1  ;;  %v2162_v59 = vmax.bf16 %v2902_v1, %v2146_v55  ;;  %v2092_v55 = vrot.slane %v2084_v52, %v3489_v3 }
 0x2c9   : > { %v1822_v61 = vpop.f32.mrb[13].mxu1 }
 0x2ca   : > { %v1824_v62 = vpop.f32.mrb[14].mxu1  ;;  %2209 = vmatprep.subr.bf16.mxu1 %v2162_v59 }
 0x2cb   : > { %v1875_v0 = vpack.c.bf16 %v1824_v62, %v1820_v58  ;;  %v1826_v2 = vpop.f32.mrb[15].mxu1  ;;  %2210 = vmatpush1.bf16.msra.mxu1 %v2161_v60 }
 0x2cc   : > { %v1876_v4 = vpack.c.bf16 %v1826_v2, %v1822_v61  ;;  %v2693_v61 = vcombine.low %v2080_v54, %v2092_v55 }
 0x2cd   : > { %v2147_v5 = vadd.bf16 %v2689_v63, %v1875_v0 }
 0x2ce   : > { %v2148_v8 = vadd.bf16 %v2689_v63, %v1876_v4 }
 0x2cf   : > { %v2163_v13 = vmax.bf16 %v2902_v1, %v2147_v5 }
 0x2d0   : > { %v1830_v11 = vpop.f32.mrb[16].mxu1  ;;  %v2164_v12 = vmax.bf16 %v2902_v1, %v2148_v8  ;;  %v2838_v8 = vld [vmem:[%s3706_s5 + $0x8] sm:$0xff]  }
 0x2d1   : > { %v1832_v14 = vpop.f32.mrb[17].mxu1 }
 0x2d2   : > { %v1834_v15 = vpop.f32.mrb[18].mxu1  ;;  %2211 = vmatprep.subr.bf16.mxu1 %v2164_v12  ;;  %v2309_v12 = vpop.permute.xlu1 %2308 }
 0x2d3   : > { %v1877_v17 = vpack.c.bf16 %v1834_v15, %v1830_v11  ;;  %v1836_v18 = vpop.f32.mrb[19].mxu1  ;;  %2212 = vmatpush1.bf16.msra.mxu1 %v2163_v13  ;;  %v2297_v11 = vpop.permute.xlu0 %2296 }
 0x2d4   : > { %v1878_v19 = vpack.c.bf16 %v1836_v18, %v1832_v14  ;;  %v2305_v13 = vrot.slane %v2297_v11, %v3489_v3  ;;  %v2317_v14 = vrot.slane %v2309_v12, %v3489_v3 }
 0x2d5   : > { %v2149_v20 = vadd.bf16 %v2690_v16, %v1877_v17 }
 0x2d6   : > { %v2150_v23 = vadd.bf16 %v2690_v16, %v1878_v19  ;;  %v2698_v18 = vcombine.low %v2305_v13, %v2317_v14  ;;  %v2333_v24 = vpop.permute.xlu1 %2332 }
 0x2d7   : > { %v2165_v28 = vmax.bf16 %v2902_v1, %v2149_v20 }
 0x2d8   : > { %v1840_v26 = vpop.f32.mrb[20].mxu1  ;;  %v2166_v27 = vmax.bf16 %v2902_v1, %v2150_v23  ;;  %v2321_v23 = vpop.permute.xlu0 %2320 }
 0x2d9   : > { %v1842_v29 = vpop.f32.mrb[21].mxu1 }
 0x2da   : > { %v1844_v30 = vpop.f32.mrb[22].mxu1  ;;  %2213 = vmatprep.subr.bf16.mxu1 %v2166_v27  ;;  %v2341_v27 = vrot.slane %v2333_v24, %v3489_v3  ;;  %v2357_v39 = vpop.permute.xlu1 %2356 }
 0x2db   : > { %v1879_v32 = vpack.c.bf16 %v1844_v30, %v1840_v26  ;;  %v1846_v33 = vpop.f32.mrb[23].mxu1  ;;  %2214 = vmatpush1.bf16.msra.mxu1 %v2165_v28  ;;  %v2329_v26 = vrot.slane %v2321_v23, %v3489_v3 }
 0x2dc   : > { %v1880_v34 = vpack.c.bf16 %v1846_v33, %v1842_v29 }
 0x2dd   : > { %v2151_v35 = vadd.bf16 %v2691_v31, %v1879_v32  ;;  %v2699_v33 = vcombine.low %v2329_v26, %v2341_v27 }
 0x2de   : > { %v2152_v38 = vadd.bf16 %v2691_v31, %v1880_v34  ;;  %v2381_v51 = vpop.permute.xlu1 %2380 }
 0x2df   : > { %v2167_v43 = vmax.bf16 %v2902_v1, %v2151_v35 }
 0x2e0   : > { %v1850_v41 = vpop.f32.mrb[24].mxu1  ;;  %v2168_v42 = vmax.bf16 %v2902_v1, %v2152_v38  ;;  %v2345_v38 = vpop.permute.xlu0 %2344 }
 0x2e1   : > { %v1852_v44 = vpop.f32.mrb[25].mxu1 }
 0x2e2   : > { %v1854_v45 = vpop.f32.mrb[26].mxu1  ;;  %2215 = vmatprep.subr.bf16.mxu1 %v2168_v42  ;;  %v2365_v42 = vrot.slane %v2357_v39, %v3489_v3 }
 0x2e3   : > { %v1881_v47 = vpack.c.bf16 %v1854_v45, %v1850_v41  ;;  %v1856_v48 = vpop.f32.mrb[27].mxu1  ;;  %2216 = vmatpush1.bf16.msra.mxu1 %v2167_v43  ;;  %v2353_v41 = vrot.slane %v2345_v38, %v3489_v3 }
 0x2e4   : > { %v1882_v49 = vpack.c.bf16 %v1856_v48, %v1852_v44  ;;  %v2369_v54 = vpop.permute.xlu0 %2368 }
 0x2e5   : > { %v2153_v50 = vadd.bf16 %v2692_v46, %v1881_v47  ;;  %v2700_v48 = vcombine.low %v2353_v41, %v2365_v42 }
 0x2e6   : > { %v2154_v53 = vadd.bf16 %v2692_v46, %v1882_v49 }
 0x2e7   : > { %v2169_v58 = vmax.bf16 %v2902_v1, %v2153_v50 }
 0x2e8   : > { %v1860_v56 = vpop.f32.mrb[28].mxu1  ;;  %v2170_v57 = vmax.bf16 %v2902_v1, %v2154_v53 }
 0x2e9   : > { %v1862_v59 = vpop.f32.mrb[29].mxu1 }
 0x2ea   : > { %v1864_v60 = vpop.f32.mrb[30].mxu1  ;;  %2217 = vmatprep.subr.bf16.mxu1 %v2170_v57  ;;  %v2389_v57 = vrot.slane %v2381_v51, %v3489_v3 }
 0x2eb   : > { %v1883_v62 = vpack.c.bf16 %v1864_v60, %v1860_v56  ;;  %v1866_v63 = vpop.f32.mrb[31].mxu1  ;;  %2218 = vmatpush1.bf16.msra.mxu1 %v2169_v58  ;;  %v2377_v56 = vrot.slane %v2369_v54, %v3489_v3 }
 0x2ec   : > { %v1884_v0 = vpack.c.bf16 %v1866_v63, %v1862_v59 }
 0x2ed   : > { %v2155_v2 = vadd.bf16 %v2693_v61, %v1883_v62  ;;  %v2701_v63 = vcombine.low %v2377_v56, %v2389_v57 }
 0x2ee   : > { %v2156_v4 = vadd.bf16 %v2693_v61, %v1884_v0 }
 0x2ef   : > { %v2171_v6 = vmax.bf16 %v2902_v1, %v2155_v2 }
 0x2f0   : > { %v2172_v5 = vmax.bf16 %v2902_v1, %v2156_v4 }
 0x2f2   : > { %2219 = vmatprep.subr.bf16.mxu1 %v2172_v5 }
 0x2f3   : > { %2220 = vmatpush1.bf16.msra.mxu1 %v2171_v6 }
 0x2f6   : > { %2238 = vmatmul.mubr.bf16.vlgmr.msra.gmra.mrb[32].mxu1 %v2837_v7 }
 0x2f7   : > { %2247 = vmatprep.mubr.bf16.mxu1 %v2902_v1 }
 0x2fe   : > { %2248 = vmatmul.mubr.bf16.gmra.mrb[36].mxu1 %v2838_v8  ;;  %v2430_v8 = vld [vmem:[%s3708_s7] sm:$0x3] }
 0x2ff   : > { %2257 = vmatprep.mubr.bf16.mxu1 %v2902_v1 }
 0x306   : > { %2258 = vmatmul.mubr.bf16.gmra.mrb[40].mxu1 %v2839_v9  ;;  %v2435_v9 = vpop.permute.xlu0 %2434 }
 0x307   : > { %2267 = vmatprep.mubr.bf16.mxu1 %v2902_v1 }
 0x30e   : > { %2268 = vmatmul.mubr.bf16.gmra.mrb[44].mxu1 %v2840_v10 }
 0x30f   : > { %2473 = vmatprep.mubr.bf16.mxu1 %v2902_v1 }
 0x3c9   : > { %v2239_v15 = vpop.f32.mrb[32].mxu1 }
 0x3ca   : > { %v2241_v16 = vpop.f32.mrb[33].mxu1 }
 0x3cb   : > { %v2243_v17 = vpop.f32.mrb[34].mxu1 }
 0x3cc   : > { %v2278_v19 = vpack.c.bf16 %v2243_v17, %v2239_v15  ;;  %v2245_v20 = vpop.f32.mrb[35].mxu1  ;;  %v2484_v15 = vld [vmem:[%s558_s15] sm:$0x77] }
 0x3cd   : > { %v2279_v21 = vpack.c.bf16 %v2245_v20, %v2241_v16  ;;  %v2486_v16 = vcombine.high %v2484_v15, %v2484_v15 }
 0x3ce   : > { %v2414_v22 = vadd.bf16 %v2698_v18, %v2278_v19 }
 0x3cf   : > { %v2415_v25 = vadd.bf16 %v2698_v18, %v2279_v21 }
 0x3d0   : > { %v2422_v30 = vmax.bf16 %v2902_v1, %v2414_v22 }
 0x3d1   : > { %v2249_v28 = vpop.f32.mrb[36].mxu1  ;;  %v2423_v29 = vmax.bf16 %v2902_v1, %v2415_v25 }
 0x3d2   : > { %v2251_v31 = vpop.f32.mrb[37].mxu1 }
 0x3d3   : > { %v2253_v32 = vpop.f32.mrb[38].mxu1  ;;  %2441 = vmatprep.subr.bf16.mxu1 %v2423_v29 }
 0x3d4   : > { %v2280_v34 = vpack.c.bf16 %v2253_v32, %v2249_v28  ;;  %v2255_v35 = vpop.f32.mrb[39].mxu1  ;;  %2442 = vmatpush1.bf16.msra.mxu1 %v2422_v30 }
 0x3d5   : > { %v2281_v36 = vpack.c.bf16 %v2255_v35, %v2251_v31 }
 0x3d6   : > { %v2416_v37 = vadd.bf16 %v2699_v33, %v2280_v34 }
 0x3d7   : > { %v2417_v40 = vadd.bf16 %v2699_v33, %v2281_v36 }
 0x3d8   : > { %v2424_v45 = vmax.bf16 %v2902_v1, %v2416_v37 }
 0x3d9   : > { %v2259_v43 = vpop.f32.mrb[40].mxu1  ;;  %v2425_v44 = vmax.bf16 %v2902_v1, %v2417_v40 }
 0x3da   : > { %v2261_v46 = vpop.f32.mrb[41].mxu1 }
 0x3db   : > { %v2263_v47 = vpop.f32.mrb[42].mxu1  ;;  %2443 = vmatprep.subr.bf16.mxu1 %v2425_v44 }
 0x3dc   : > { %v2282_v49 = vpack.c.bf16 %v2263_v47, %v2259_v43  ;;  %v2265_v50 = vpop.f32.mrb[43].mxu1  ;;  %2444 = vmatpush1.bf16.msra.mxu1 %v2424_v45 }
 0x3dd   : > { %v2283_v52 = vpack.c.bf16 %v2265_v50, %v2261_v46 }
 0x3de   : > { %v2418_v53 = vadd.bf16 %v2700_v48, %v2282_v49 }
 0x3df   : > { %v2419_v55 = vadd.bf16 %v2700_v48, %v2283_v52 }
 0x3e0   : > { %v2426_v60 = vmax.bf16 %v2902_v1, %v2418_v53 }
 0x3e1   : > { %v2269_v58 = vpop.f32.mrb[44].mxu1  ;;  %v2427_v59 = vmax.bf16 %v2902_v1, %v2419_v55 }
 0x3e2   : > { %v2271_v61 = vpop.f32.mrb[45].mxu1 }
 0x3e3   : > { %v2273_v62 = vpop.f32.mrb[46].mxu1  ;;  %2445 = vmatprep.subr.bf16.mxu1 %v2427_v59 }
 0x3e4   : > { %v2284_v0 = vpack.c.bf16 %v2273_v62, %v2269_v58  ;;  %v2275_v2 = vpop.f32.mrb[47].mxu1  ;;  %2446 = vmatpush1.bf16.msra.mxu1 %v2426_v60 }
 0x3e5   : > { %v2285_v4 = vpack.c.bf16 %v2275_v2, %v2271_v61 }
 0x3e6   : > { %v2420_v5 = vadd.bf16 %v2701_v63, %v2284_v0 }
 0x3e7   : > { %v2421_v6 = vadd.bf16 %v2701_v63, %v2285_v4 }
 0x3e8   : > { %v2428_v7 = vmax.bf16 %v2902_v1, %v2420_v5 }
 0x3e9   : > { %v2429_v3 = vmax.bf16 %v2902_v1, %v2421_v6 }
 0x3eb   : > { %2447 = vmatprep.subr.bf16.mxu1 %v2429_v3 }
 0x3ec   : > { %2448 = vmatpush1.bf16.msra.mxu1 %v2428_v7 }
 0x3ef   : > { %2702 = vmatmul.mubr.msk.bf16.vlgmr.msra.gmra.mrb[48].mxu1 %vm2437_vm0, %v2430_v8 }
 0x4c2   : > { %v2475_v10 = vpop.f32.mrb[48].mxu1 }
 0x4c3   : > { %v2476_v11 = vadd.f32 %v2475_v10, %v2435_v9  ;;  %v2477_v12 = vpop.f32.mrb[49].mxu1 }
 0x4c4   : > { %v2478_v1 = vadd.f32 %v2477_v12, %v2435_v9  ;;  %v2479_v13 = vpop.f32.mrb[50].mxu1 }
 0x4c5   : > { %2842 = vtanh.f32 %v2476_v11  ;;  %v2480_v14 = vpop.f32.mrb[51].mxu1 }
 0x4c6   : > { %2844 = vtanh.f32 %v2478_v1 }
 0x4cf   : > { %v2843_v17 = vpop.eup %2842 }
 0x4d0   : > { %v2845_v18 = vpop.eup %2844  ;;  %v2488_v19 = vadd.f32 %v2843_v17, %v2484_v15 }
 0x4d1   : > { %v2489_v20 = vadd.f32 %v2845_v18, %v2486_v16 }
 0x4d3   : > { %v2492_v21 = vcombine.low %v2488_v19, %v2489_v20 }
 0x4d5   : > { %2494 = vst [vmem:[%s568_s22] sm:$0x77] %v2492_v21 }
 0x4d6 PF: > { %s20_s19 = sadd.s32 1, %s2900_s19   ;;  %s3716_s23 = sld [smem:[#allocation3_spill]] }
 0x4d7   : > { %p17_p12 = scmp.ge.s32.totalorder %s20_s19, 6   ;;  %s3717_s20 = sld [smem:[#allocation4_spill]] }
 0x4d8   : > { %s3718_s13 = smov %s2880_s14  ;;  %s3719_s14 = smov %s3010_s26 }
 0x4d9   : > { %s3720_s15 = smov %s2892_s17  ;;  %s3721_s16 = smov %s2896_s18 }
 0x4da   :  { %19 = sbr.rel (!%p17_p12) target bundleno = 4 (0x4), region = 121 }
 0x4dc   : > { %s3722_s17 = smov %s3716_s23 }
 0x4dd   : > { %s3723_s18 = smov %s3717_s20 }

</bundles_post_ra>
